<compile_context>
chip_gen: v7x
topology: tpu7x:2x2x1
jax: 0.10.0
libtpu: 0.0.40
codegen_flags: <defaults>
</compile_context>

<pallas_src>
import functools

import jax
import jax.numpy as jnp
from jax.experimental import pallas as pl
from jax.experimental.pallas import tpu as pltpu

# ----------------------- small synthetic BERT config ------------------------
VOCAB_SIZE = 64
TYPE_VOCAB_SIZE = 2
MAX_POS = 16
HIDDEN = 32          # stands in for 768
NUM_HEADS = 4
HEAD_DIM = HIDDEN // NUM_HEADS
FFN = 4 * HIDDEN
NUM_LAYERS = 2       # stands in for 12
NUM_REL = 4          # const.NUM_REL
HEAD_PAD = 128       # l4 output padded to a full 128-lane tile (sliced in wrapper)
LN_EPS = 1e-12

# Preferred tile sizes (big-M tiles per review; demo shapes fall back to full extents).
TILE_M = 256         # multiple of 16 -> bf16 activation blocks pack sublanes cleanly
TILE_N = 512         # keep <= N/2 at real sizes so the N axis still splits across TCs (v7x)


def _default_tile_k():
    # v5-class MXU is 128 deep; v6e / v7x are 256 deep.
    try:
        kind = jax.devices()[0].device_kind.lower()
        if "v5" in kind:
            return 128
    except Exception:
        pass
    return 256


TILE_K = _default_tile_k()


def _pick_tile(dim, preferred, align):
    """Largest tile <= preferred that divides dim and is a multiple of align,
    falling back to the full dim (full-extent blocks are always legal)."""
    if dim <= preferred:
        return dim
    t = (preferred // align) * align
    while t >= align:
        if dim % t == 0:
            return t
        t -= align
    return dim


def _vmem_limit(*tile_bytes):
    """Explicit scoped-VMEM limit from the tile working set (double-buffered),
    clamped to [32 MiB, 64 MiB] so it is valid on every generation (v7x: 64 MiB)."""
    est = 3 * sum(tile_bytes)
    return min(max(est, 32 * 1024 * 1024), 64 * 1024 * 1024)


# ------------------------------ Pallas kernels ------------------------------
def _matmul_bias_act_kernel(x_ref, w_ref, b_ref, o_ref, acc_ref, *, activation):
    """o = act(x @ w + b), K-tiled with an f32 VMEM accumulator.
    x:(tm,tk) bf16, w:(tk,tn) bf16, b:(1,tn) f32, o:(tm,tn) bf16."""
    k = pl.program_id(2)

    @pl.when(k == 0)
    def _():
        acc_ref[...] = jnp.zeros_like(acc_ref)

    acc_ref[...] += jnp.dot(x_ref[...].astype(jnp.bfloat16), w_ref[...],
                            preferred_element_type=jnp.float32)

    @pl.when(k == pl.num_programs(2) - 1)
    def _():
        y = acc_ref[...] + b_ref[...]
        if activation == "gelu":
            # tanh-approximate GELU (EUP); ~1e-3 delta vs exact erf GELU.
            y = 0.5 * y * (1.0 + jnp.tanh(0.7978845608028654
                                          * (y + 0.044715 * y * y * y)))
        o_ref[...] = y.astype(o_ref.dtype)


def _matmul_residual_ln_kernel(x_ref, w_ref, b_ref, res_ref, g_ref, beta_ref,
                               o_ref, acc_ref):
    """o = LayerNorm(x @ w + b + residual).  N tile is the full hidden dim."""
    k = pl.program_id(1)

    @pl.when(k == 0)
    def _():
        acc_ref[...] = jnp.zeros_like(acc_ref)

    acc_ref[...] += jnp.dot(x_ref[...].astype(jnp.bfloat16), w_ref[...],
                            preferred_element_type=jnp.float32)

    @pl.when(k == pl.num_programs(1) - 1)
    def _():
        y = acc_ref[...] + b_ref[...] + res_ref[...].astype(jnp.float32)
        mu = jnp.mean(y, axis=-1, keepdims=True)
        var = jnp.mean((y - mu) * (y - mu), axis=-1, keepdims=True)
        out = (y - mu) * jax.lax.rsqrt(var + LN_EPS) * g_ref[...] + beta_ref[...]
        o_ref[...] = out.astype(o_ref.dtype)


def _layernorm_kernel(x_ref, g_ref, b_ref, o_ref):
    """Row-wise LayerNorm (embedding output).  x:(tm,H) f32, g,b:(1,H), o bf16."""
    x = x_ref[...]
    mu = jnp.mean(x, axis=-1, keepdims=True)
    var = jnp.mean((x - mu) * (x - mu), axis=-1, keepdims=True)
    out = (x - mu) * jax.lax.rsqrt(var + LN_EPS) * g_ref[...] + b_ref[...]
    o_ref[...] = out.astype(o_ref.dtype)


def _attention_kernel(q_ref, kv_ref, bias_ref, o_ref, *, num_heads, head_dim):
    """Per-(batch, query-tile) attention straight on the fused qkv activation.
    q_ref:(1,tq,3H) bf16, kv_ref:(1,S,3H) bf16, bias:(1,1,S) f32, o:(1,tq,H) bf16.
    1/sqrt(head_dim) is already folded into the Q weights at init."""
    H = num_heads * head_dim
    qkv_q = q_ref[0]                                   # (tq, 3H) bf16
    qkv_kv = kv_ref[0]                                 # (S, 3H) bf16
    bias = bias_ref[0]                                 # (1, S) f32
    ctx_heads = []
    for h in range(num_heads):                         # static unroll over heads
        q = qkv_q[:, h * head_dim:(h + 1) * head_dim]
        k = qkv_kv[:, H + h * head_dim:H + (h + 1) * head_dim]
        v = qkv_kv[:, 2 * H + h * head_dim:2 * H + (h + 1) * head_dim]
        s = jnp.dot(q, k.T, preferred_element_type=jnp.float32) + bias   # (tq, S) f32
        m = jnp.max(s, axis=-1, keepdims=True)
        p = jnp.exp(s - m)
        denom = jnp.sum(p, axis=-1, keepdims=True)
        p = p * pl.reciprocal(denom, approx=True)                         # EUP slot
        ctx_heads.append(jnp.dot(p.astype(jnp.bfloat16), v,
                                 preferred_element_type=jnp.float32))
    # One lane-dense store at the full hidden width.
    o_ref[...] = jnp.concatenate(ctx_heads, axis=-1)[None].astype(o_ref.dtype)


def _head_kernel(cls_ref, pw_ref, pb_ref, w2_ref, b2_ref, w4_ref, b4_ref, o_ref):
    """Fused pooler(tanh) -> l2 -> dropout(identity) -> l4 over a (tb, H) CLS tile.
    Output padded to HEAD_PAD lanes; wrapper slices to NUM_REL."""
    cls = cls_ref[...].astype(jnp.bfloat16)
    pooled = jnp.tanh(jnp.dot(cls, pw_ref[...],
                              preferred_element_type=jnp.float32) + pb_ref[...])
    out2 = jnp.dot(pooled.astype(jnp.bfloat16), w2_ref[...],
                   preferred_element_type=jnp.float32) + b2_ref[...]
    # Dropout (self.l3) at inference = identity.
    logits = jnp.dot(out2.astype(jnp.bfloat16), w4_ref[...],
                     preferred_element_type=jnp.float32) + b4_ref[...]
    o_ref[...] = logits


# ----------------------------- Pallas wrappers -------------------------------
def pallas_linear(x, w_bf16, b, activation="none"):
    M, K = x.shape
    assert w_bf16.shape[0] == K
    N = w_bf16.shape[1]
    tm = _pick_tile(M, TILE_M, 16)
    tn = _pick_tile(N, TILE_N, 128)
    tk = _pick_tile(K, TILE_K, 128)
    kern = functools.partial(_matmul_bias_act_kernel, activation=activation)
    return pl.pallas_call(
        kern,
        grid=(M // tm, N // tn, K // tk),
        in_specs=[
            pl.BlockSpec((tm, tk), lambda i, j, k: (i, k)),
            pl.BlockSpec((tk, tn), lambda i, j, k: (k, j)),
            pl.BlockSpec((1, tn), lambda i, j, k: (0, j)),
        ],
        out_specs=pl.BlockSpec((tm, tn), lambda i, j, k: (i, j)),
        out_shape=jax.ShapeDtypeStruct((M, N), jnp.bfloat16),
        scratch_shapes=[pltpu.VMEM((tm, tn), jnp.float32)],
        compiler_params=pltpu.CompilerParams(
            dimension_semantics=("parallel", "parallel", "arbitrary"),
            vmem_limit_bytes=_vmem_limit(tm * tk * 2, tk * tn * 2, tn * 4,
                                         tm * tn * 2, tm * tn * 4)),
    )(x, w_bf16, b.reshape(1, N))


def pallas_linear_residual_ln(x, w_bf16, b, residual, gamma, beta):
    M, K = x.shape
    N = w_bf16.shape[1]
    tm = _pick_tile(M, TILE_M, 16)
    tk = _pick_tile(K, TILE_K, 128)
    return pl.pallas_call(
        _matmul_residual_ln_kernel,
        grid=(M // tm, K // tk),
        in_specs=[
            pl.BlockSpec((tm, tk), lambda i, k: (i, k)),
            pl.BlockSpec((tk, N), lambda i, k: (k, 0)),
            pl.BlockSpec((1, N), lambda i, k: (0, 0)),
            pl.BlockSpec((tm, N), lambda i, k: (i, 0)),
            pl.BlockSpec((1, N), lambda i, k: (0, 0)),
            pl.BlockSpec((1, N), lambda i, k: (0, 0)),
        ],
        out_specs=pl.BlockSpec((tm, N), lambda i, k: (i, 0)),
        out_shape=jax.ShapeDtypeStruct((M, N), jnp.bfloat16),
        scratch_shapes=[pltpu.VMEM((tm, N), jnp.float32)],
        compiler_params=pltpu.CompilerParams(
            dimension_semantics=("parallel", "arbitrary"),
            vmem_limit_bytes=_vmem_limit(tm * tk * 2, tk * N * 2, 3 * N * 4,
                                         tm * N * 2, tm * N * 2, tm * N * 4)),
    )(x, w_bf16, b.reshape(1, N), residual, gamma.reshape(1, N), beta.reshape(1, N))


def pallas_layernorm(x, gamma, beta):
    M, H = x.shape
    tm = _pick_tile(M, TILE_M, 16)
    return pl.pallas_call(
        _layernorm_kernel,
        grid=(M // tm,),
        in_specs=[
            pl.BlockSpec((tm, H), lambda i: (i, 0)),
            pl.BlockSpec((1, H), lambda i: (0, 0)),
            pl.BlockSpec((1, H), lambda i: (0, 0)),
        ],
        out_specs=pl.BlockSpec((tm, H), lambda i: (i, 0)),
        out_shape=jax.ShapeDtypeStruct((M, H), jnp.bfloat16),
        compiler_params=pltpu.CompilerParams(dimension_semantics=("parallel",)),
    )(x, gamma.reshape(1, H), beta.reshape(1, H))


def pallas_attention(qkv3, bias_b1s):
    """qkv3: (B, S, 3H) bf16 fused projection; bias_b1s: (B, 1, S) f32 additive mask.
    Returns (B, S, H) bf16 context."""
    B, S, H3 = qkv3.shape
    H = H3 // 3
    tq = _pick_tile(S, 128, 16)      # query tile; 128 at real seq lengths
    nq = S // tq
    kern = functools.partial(_attention_kernel,
                             num_heads=NUM_HEADS, head_dim=HEAD_DIM)
    return pl.pallas_call(
        kern,
        grid=(B, nq),
        in_specs=[
            pl.BlockSpec((1, tq, H3), lambda b, qi: (b, qi, 0)),   # Q rows of this tile
            pl.BlockSpec((1, S, H3), lambda b, qi: (b, 0, 0)),     # full K/V of this batch
            pl.BlockSpec((1, 1, S), lambda b, qi: (b, 0, 0)),      # additive mask bias
        ],
        out_specs=pl.BlockSpec((1, tq, H), lambda b, qi: (b, qi, 0)),
        out_shape=jax.ShapeDtypeStruct((B, S, H), jnp.bfloat16),
        compiler_params=pltpu.CompilerParams(
            dimension_semantics=("parallel", "parallel")),
    )(qkv3, qkv3, bias_b1s)


def pallas_head(cls, pool_w, pool_b, l2_w, l2_b, l4_w_pad, l4_b_pad):
    B, H = cls.shape
    Npad = l4_w_pad.shape[1]
    tb = _pick_tile(B, TILE_M, 16)
    return pl.pallas_call(
        _head_kernel,
        grid=(B // tb,),
        in_specs=[
            pl.BlockSpec((tb, H), lambda i: (i, 0)),
            pl.BlockSpec((H, H), lambda i: (0, 0)),
            pl.BlockSpec((1, H), lambda i: (0, 0)),
            pl.BlockSpec((H, H), lambda i: (0, 0)),
            pl.BlockSpec((1, H), lambda i: (0, 0)),
            pl.BlockSpec((H, Npad), lambda i: (0, 0)),
            pl.BlockSpec((1, Npad), lambda i: (0, 0)),
        ],
        out_specs=pl.BlockSpec((tb, Npad), lambda i: (i, 0)),
        out_shape=jax.ShapeDtypeStruct((B, Npad), jnp.float32),
        compiler_params=pltpu.CompilerParams(dimension_semantics=("parallel",)),
    )(cls, pool_w, pool_b.reshape(1, H), l2_w, l2_b.reshape(1, H),
      l4_w_pad, l4_b_pad.reshape(1, Npad))


# ------------------------------ parameter init -------------------------------
def init_params(key):
    params = {}
    std = 0.02

    def nrm(k, shape):
        return jax.random.normal(k, shape, jnp.float32) * std

    keys = iter(jax.random.split(key, 256))
    params["word_emb"] = nrm(next(keys), (VOCAB_SIZE, HIDDEN))
    params["pos_emb"] = nrm(next(keys), (MAX_POS, HIDDEN))
    params["type_emb"] = nrm(next(keys), (TYPE_VOCAB_SIZE, HIDDEN))
    params["emb_ln_g"] = jnp.ones((HIDDEN,), jnp.float32)
    params["emb_ln_b"] = jnp.zeros((HIDDEN,), jnp.float32)

    scale = 1.0 / float(HEAD_DIM) ** 0.5
    layers = []
    for _ in range(NUM_LAYERS):
        # 1/sqrt(head_dim) folded into the Q weights (and Q bias, here zero) at init.
        q_w = nrm(next(keys), (HIDDEN, HIDDEN)) * scale
        k_w = nrm(next(keys), (HIDDEN, HIDDEN))
        v_w = nrm(next(keys), (HIDDEN, HIDDEN))
        lyr = {
            # fused QKV projection: one (H, 3H) bf16 weight
            "qkv_w": jnp.concatenate([q_w, k_w, v_w], axis=1).astype(jnp.bfloat16),
            "qkv_b": jnp.zeros((3 * HIDDEN,), jnp.float32),
            "ao_w": nrm(next(keys), (HIDDEN, HIDDEN)).astype(jnp.bfloat16),
            "ao_b": jnp.zeros((HIDDEN,), jnp.float32),
            "attn_ln_g": jnp.ones((HIDDEN,), jnp.float32),
            "attn_ln_b": jnp.zeros((HIDDEN,), jnp.float32),
            "ffn_in_w": nrm(next(keys), (HIDDEN, FFN)).astype(jnp.bfloat16),
            "ffn_in_b": jnp.zeros((FFN,), jnp.float32),
            "ffn_out_w": nrm(next(keys), (FFN, HIDDEN)).astype(jnp.bfloat16),
            "ffn_out_b": jnp.zeros((HIDDEN,), jnp.float32),
            "ffn_ln_g": jnp.ones((HIDDEN,), jnp.float32),
            "ffn_ln_b": jnp.zeros((HIDDEN,), jnp.float32),
        }
        layers.append(lyr)
    params["layers"] = layers

    params["pool_w"] = nrm(next(keys), (HIDDEN, HIDDEN)).astype(jnp.bfloat16)
    params["pool_b"] = jnp.zeros((HIDDEN,), jnp.float32)

    # head: l2 = Linear(768,768), l4 = Linear(768, NUM_REL) padded to 128 lanes
    params["l2_w"] = nrm(next(keys), (HIDDEN, HIDDEN)).astype(jnp.bfloat16)
    params["l2_b"] = jnp.zeros((HIDDEN,), jnp.float32)
    l4_w = nrm(next(keys), (HIDDEN, NUM_REL))
    params["l4_w_pad"] = (jnp.zeros((HIDDEN, HEAD_PAD), jnp.float32)
                          .at[:, :NUM_REL].set(l4_w).astype(jnp.bfloat16))
    params["l4_b_pad"] = jnp.zeros((HEAD_PAD,), jnp.float32)
    return params


# ------------------------------ forward pass ---------------------------------
def bert_class_forward(params, ids, mask, token_type_ids):
    B, S = ids.shape
    H = HIDDEN

    # ----- embeddings (gather = glue, layernorm = Pallas) -----
    pos = jnp.arange(S, dtype=jnp.int32)
    emb = (params["word_emb"][ids]
           + params["pos_emb"][pos][None, :, :]
           + params["type_emb"][token_type_ids])
    hidden = pallas_layernorm(emb.reshape(B * S, H),
                              params["emb_ln_g"], params["emb_ln_b"])   # (B*S, H) bf16

    # additive attention mask bias, (B, 1, S); broadcast over heads inside the kernel
    attn_bias = ((1.0 - mask.astype(jnp.float32)) * -1e9).reshape(B, 1, S)

    for lyr in params["layers"]:
        x2d = hidden                                               # (B*S, H) bf16

        # fused QKV projection (single matmul launch), bf16 activations
        qkv = pallas_linear(x2d, lyr["qkv_w"], lyr["qkv_b"])       # (B*S, 3H) bf16

        # attention reads the fused qkv directly (free reshape, no transposes/splits)
        ctx = pallas_attention(qkv.reshape(B, S, 3 * H), attn_bias)  # (B, S, H) bf16
        ctx2d = ctx.reshape(B * S, H)

        # attention output projection + residual + LN fused in one kernel
        hidden = pallas_linear_residual_ln(ctx2d, lyr["ao_w"], lyr["ao_b"],
                                           x2d, lyr["attn_ln_g"], lyr["attn_ln_b"])

        # FFN: matmul+bias+GELU fused, then matmul+bias+residual+LN fused
        ffn_h = pallas_linear(hidden, lyr["ffn_in_w"], lyr["ffn_in_b"],
                              activation="gelu")
        hidden = pallas_linear_residual_ln(ffn_h, lyr["ffn_out_w"], lyr["ffn_out_b"],
                                           hidden, lyr["ffn_ln_g"], lyr["ffn_ln_b"])

    # ----- fused head: pooler(tanh) -> l2 -> dropout(identity) -> l4 -----
    cls = hidden.reshape(B, S, H)[:, 0, :]                         # (B, H) bf16
    logits_pad = pallas_head(cls, params["pool_w"], params["pool_b"],
                             params["l2_w"], params["l2_b"],
                             params["l4_w_pad"], params["l4_b_pad"])
    return logits_pad[:, :NUM_REL]                                 # (B, NUM_REL) f32


# ---------------------------------- main --------------------------------------
if __name__ == "__main__":
    B, S = 2, 8
    key = jax.random.PRNGKey(0)
    k_param, k_ids, k_type = jax.random.split(key, 3)

    params = init_params(k_param)

    ids = jax.random.randint(k_ids, (B, S), 0, VOCAB_SIZE, dtype=jnp.int32)
    mask = jnp.ones((B, S), jnp.int32).at[1, 6:].set(0)            # pad last 2 tokens of row 1
    token_type_ids = jax.random.randint(k_type, (B, S), 0, TYPE_VOCAB_SIZE, dtype=jnp.int32)

    fwd = jax.jit(bert_class_forward)
    logits = fwd(params, ids, mask, token_type_ids)
    logits = jax.block_until_ready(logits)

    assert logits.shape == (B, NUM_REL), logits.shape
    assert jnp.all(jnp.isfinite(logits))
    print("KERNEL_OK")
</pallas_src>

<mosaic_0001>
module attributes {stable_mosaic.version = 11 : i64} {
  func.func @_matmul_bias_act_kernel(%arg0: i32, %arg1: i32, %arg2: i32, %arg3: memref<16x32xbf16, #tpu.memory_space<vmem>>, %arg4: memref<32x96xbf16, #tpu.memory_space<vmem>>, %arg5: memref<1x96xf32, #tpu.memory_space<vmem>>, %arg6: memref<16x96xbf16, #tpu.memory_space<vmem>>, %arg7: memref<16x96xf32, #tpu.memory_space<vmem>>) attributes {dimension_semantics = [#tpu.dimension_semantics<parallel>, #tpu.dimension_semantics<parallel>, #tpu.dimension_semantics<arbitrary>], iteration_bounds = array<i64: 1, 1, 1>, scalar_prefetch = 0 : i64, scratch_operands = 1 : i64, tpu.core_type = #tpu.core_type<tc>, window_params = [{transform_indices = @transform_0, window_bounds = array<i64: 16, 32>}, {transform_indices = @transform_1, window_bounds = array<i64: 32, 96>}, {transform_indices = @transform_2, window_bounds = array<i64: 1, 96>}, {transform_indices = @transform_3, window_bounds = array<i64: 16, 96>}]} {
    %c0_i32 = arith.constant 0 : i32
    %0 = arith.cmpi eq, %arg2, %c0_i32 : i32
    %1 = arith.extui %0 : i1 to i32
    %c0_i32_0 = arith.constant 0 : i32
    %2 = arith.cmpi ne, %1, %c0_i32_0 : i32
    scf.if %2 {
      %cst_10 = arith.constant 0.000000e+00 : f32
      %12 = vector.broadcast %cst_10 : f32 to vector<16x96xf32>
      %c0_11 = arith.constant 0 : index
      %c0_12 = arith.constant 0 : index
      %13 = vector.load %arg7[%c0_11, %c0_12] : memref<16x96xf32, #tpu.memory_space<vmem>>, vector<16x96xf32>
      tpu.vector_store %arg7[%c0_11, %c0_12], %12 {strides = array<i32>} : memref<16x96xf32, #tpu.memory_space<vmem>>, vector<16x96xf32>,
    } else {
    }
    %c0 = arith.constant 0 : index
    %c0_1 = arith.constant 0 : index
    %3 = vector.load %arg7[%c0, %c0_1] : memref<16x96xf32, #tpu.memory_space<vmem>>, vector<16x96xf32>
    %c0_2 = arith.constant 0 : index
    %c0_3 = arith.constant 0 : index
    %4 = vector.load %arg3[%c0_2, %c0_3] : memref<16x32xbf16, #tpu.memory_space<vmem>>, vector<16x32xbf16>
    %c0_4 = arith.constant 0 : index
    %c0_5 = arith.constant 0 : index
    %5 = vector.load %arg4[%c0_4, %c0_5] : memref<32x96xbf16, #tpu.memory_space<vmem>>, vector<32x96xbf16>
    %cst = arith.constant dense<0.000000e+00> : vector<16x96xf32>
    %6 = tpu.matmul %4, %5, %cst {dimension_numbers = #tpu.dot_dimension_numbers<[1], [0], [0], [1], [0, 0, 1, 1], [], []>} : vector<16x32xbf16>, vector<32x96xbf16>, vector<16x96xf32> -> vector<16x96xf32>
    %7 = arith.addf %3, %6 : vector<16x96xf32>
    %c0_6 = arith.constant 0 : index
    %c0_7 = arith.constant 0 : index
    %8 = vector.load %arg7[%c0_6, %c0_7] : memref<16x96xf32, #tpu.memory_space<vmem>>, vector<16x96xf32>
    tpu.vector_store %arg7[%c0_6, %c0_7], %7 {strides = array<i32>} : memref<16x96xf32, #tpu.memory_space<vmem>>, vector<16x96xf32>,
    %c0_i32_8 = arith.constant 0 : i32
    %9 = arith.cmpi eq, %arg2, %c0_i32_8 : i32
    %10 = arith.extui %9 : i1 to i32
    %c0_i32_9 = arith.constant 0 : i32
    %11 = arith.cmpi ne, %10, %c0_i32_9 : i32
    scf.if %11 {
      %c0_10 = arith.constant 0 : index
      %c0_11 = arith.constant 0 : index
      %12 = vector.load %arg7[%c0_10, %c0_11] : memref<16x96xf32, #tpu.memory_space<vmem>>, vector<16x96xf32>
      %c0_12 = arith.constant 0 : index
      %c0_13 = arith.constant 0 : index
      %13 = vector.load %arg5[%c0_12, %c0_13] : memref<1x96xf32, #tpu.memory_space<vmem>>, vector<1x96xf32>
      %14 = vector.broadcast %13 : vector<1x96xf32> to vector<16x96xf32>
      %15 = arith.addf %12, %14 : vector<16x96xf32>
      %16 = arith.truncf %15 : vector<16x96xf32> to vector<16x96xbf16>
      %c0_14 = arith.constant 0 : index
      %c0_15 = arith.constant 0 : index
      %17 = vector.load %arg6[%c0_14, %c0_15] : memref<16x96xbf16, #tpu.memory_space<vmem>>, vector<16x96xbf16>
      tpu.vector_store %arg6[%c0_14, %c0_15], %16 {strides = array<i32>} : memref<16x96xbf16, #tpu.memory_space<vmem>>, vector<16x96xbf16>,
    } else {
    }
    return
  }
  func.func @transform_0(%arg0: i32, %arg1: i32, %arg2: i32) -> (i32, i32) {
    %c0_i32 = arith.constant 0 : i32
    return %arg0, %arg2 : i32, i32
  }
  func.func @transform_1(%arg0: i32, %arg1: i32, %arg2: i32) -> (i32, i32) {
    %c0_i32 = arith.constant 0 : i32
    return %arg2, %arg1 : i32, i32
  }
  func.func @transform_2(%arg0: i32, %arg1: i32, %arg2: i32) -> (i32, i32) {
    %c0_i32 = arith.constant 0 : i32
    %c0_i32_0 = arith.constant 0 : i32
    return %c0_i32, %arg1 : i32, i32
  }
  func.func @transform_3(%arg0: i32, %arg1: i32, %arg2: i32) -> (i32, i32) {
    %c0_i32 = arith.constant 0 : i32
    return %arg0, %arg1 : i32, i32
  }
}

module attributes {stable_mosaic.version = 11 : i64} {
  func.func @_layernorm_kernel(%arg0: i32, %arg1: memref<16x32xf32, #tpu.memory_space<vmem>>, %arg2: memref<1x32xf32, #tpu.memory_space<vmem>>, %arg3: memref<1x32xf32, #tpu.memory_space<vmem>>, %arg4: memref<16x32xbf16, #tpu.memory_space<vmem>>) attributes {dimension_semantics = [#tpu.dimension_semantics<parallel>], iteration_bounds = array<i64: 1>, scalar_prefetch = 0 : i64, scratch_operands = 0 : i64, tpu.core_type = #tpu.core_type<tc>, window_params = [{transform_indices = @transform_0, window_bounds = array<i64: 16, 32>}, {pipeline_mode = #tpu.pipeline_mode<synchronous>, transform_indices = @transform_1, window_bounds = array<i64: 1, 32>}, {pipeline_mode = #tpu.pipeline_mode<synchronous>, transform_indices = @transform_2, window_bounds = array<i64: 1, 32>}, {transform_indices = @transform_3, window_bounds = array<i64: 16, 32>}]} {
    %c0 = arith.constant 0 : index
    %c0_0 = arith.constant 0 : index
    %0 = vector.load %arg1[%c0, %c0_0] : memref<16x32xf32, #tpu.memory_space<vmem>>, vector<16x32xf32>
    %cst = arith.constant dense<0.000000e+00> : vector<16xf32>
    %1 = vector.multi_reduction <add>, %0, %cst [1] : vector<16x32xf32> to vector<16xf32>
    %2 = vector.shape_cast %1 : vector<16xf32> to vector<16x1xf32>
    %cst_1 = arith.constant 3.200000e+01 : f32
    %3 = vector.broadcast %cst_1 : f32 to vector<16x1xf32>
    %4 = arith.divf %2, %3 : vector<16x1xf32>
    %5 = vector.broadcast %4 : vector<16x1xf32> to vector<16x32xf32>
    %6 = arith.subf %0, %5 : vector<16x32xf32>
    %7 = vector.broadcast %4 : vector<16x1xf32> to vector<16x32xf32>
    %8 = arith.subf %0, %7 : vector<16x32xf32>
    %9 = arith.mulf %6, %8 : vector<16x32xf32>
    %cst_2 = arith.constant dense<0.000000e+00> : vector<16xf32>
    %10 = vector.multi_reduction <add>, %9, %cst_2 [1] : vector<16x32xf32> to vector<16xf32>
    %11 = vector.shape_cast %10 : vector<16xf32> to vector<16x1xf32>
    %cst_3 = arith.constant 3.200000e+01 : f32
    %12 = vector.broadcast %cst_3 : f32 to vector<16x1xf32>
    %13 = arith.divf %11, %12 : vector<16x1xf32>
    %14 = vector.broadcast %4 : vector<16x1xf32> to vector<16x32xf32>
    %15 = arith.subf %0, %14 : vector<16x32xf32>
    %cst_4 = arith.constant 9.99999996E-13 : f32
    %16 = vector.broadcast %cst_4 : f32 to vector<16x1xf32>
    %17 = arith.addf %13, %16 : vector<16x1xf32>
    %18 = math.rsqrt %17 : vector<16x1xf32>
    %19 = vector.broadcast %18 : vector<16x1xf32> to vector<16x32xf32>
    %20 = arith.mulf %15, %19 : vector<16x32xf32>
    %c0_5 = arith.constant 0 : index
    %c0_6 = arith.constant 0 : index
    %21 = vector.load %arg2[%c0_5, %c0_6] : memref<1x32xf32, #tpu.memory_space<vmem>>, vector<1x32xf32>
    %22 = vector.broadcast %21 : vector<1x32xf32> to vector<16x32xf32>
    %23 = arith.mulf %20, %22 : vector<16x32xf32>
    %c0_7 = arith.constant 0 : index
    %c0_8 = arith.constant 0 : index
    %24 = vector.load %arg3[%c0_7, %c0_8] : memref<1x32xf32, #tpu.memory_space<vmem>>, vector<1x32xf32>
    %25 = vector.broadcast %24 : vector<1x32xf32> to vector<16x32xf32>
    %26 = arith.addf %23, %25 : vector<16x32xf32>
    %27 = arith.truncf %26 : vector<16x32xf32> to vector<16x32xbf16>
    %c0_9 = arith.constant 0 : index
    %c0_10 = arith.constant 0 : index
    %28 = vector.load %arg4[%c0_9, %c0_10] : memref<16x32xbf16, #tpu.memory_space<vmem>>, vector<16x32xbf16>
    tpu.vector_store %arg4[%c0_9, %c0_10], %27 {strides = array<i32>} : memref<16x32xbf16, #tpu.memory_space<vmem>>, vector<16x32xbf16>,
    return
  }
  func.func @transform_0(%arg0: i32) -> (i32, i32) {
    %c0_i32 = arith.constant 0 : i32
    %c0_i32_0 = arith.constant 0 : i32
    return %arg0, %c0_i32 : i32, i32
  }
  func.func @transform_1(%arg0: i32) -> (i32, i32) {
    %c0_i32 = arith.constant 0 : i32
    %c0_i32_0 = arith.constant 0 : i32
    %c0_i32_1 = arith.constant 0 : i32
    return %c0_i32, %c0_i32_0 : i32, i32
  }
  func.func @transform_2(%arg0: i32) -> (i32, i32) {
    %c0_i32 = arith.constant 0 : i32
    %c0_i32_0 = arith.constant 0 : i32
    %c0_i32_1 = arith.constant 0 : i32
    return %c0_i32, %c0_i32_0 : i32, i32
  }
  func.func @transform_3(%arg0: i32) -> (i32, i32) {
    %c0_i32 = arith.constant 0 : i32
    %c0_i32_0 = arith.constant 0 : i32
    return %arg0, %c0_i32 : i32, i32
  }
}

module attributes {stable_mosaic.version = 11 : i64} {
  func.func @_attention_kernel(%arg0: i32, %arg1: i32, %arg2: memref<1x8x96xbf16, #tpu.memory_space<vmem>>, %arg3: memref<1x8x96xbf16, #tpu.memory_space<vmem>>, %arg4: memref<1x1x8xf32, #tpu.memory_space<vmem>>, %arg5: memref<1x8x32xbf16, #tpu.memory_space<vmem>>) attributes {dimension_semantics = [#tpu.dimension_semantics<parallel>, #tpu.dimension_semantics<parallel>], iteration_bounds = array<i64: 2, 1>, scalar_prefetch = 0 : i64, scratch_operands = 0 : i64, tpu.core_type = #tpu.core_type<tc>, window_params = [{transform_indices = @transform_0, window_bounds = array<i64: 1, 8, 96>}, {transform_indices = @transform_1, window_bounds = array<i64: 1, 8, 96>}, {transform_indices = @transform_2, window_bounds = array<i64: 1, 1, 8>}, {transform_indices = @transform_3, window_bounds = array<i64: 1, 8, 32>}]} {
    %c0 = arith.constant 0 : index
    %c0_0 = arith.constant 0 : index
    %c0_1 = arith.constant 0 : index
    %0 = vector.load %arg2[%c0, %c0_0, %c0_1] : memref<1x8x96xbf16, #tpu.memory_space<vmem>>, vector<1x8x96xbf16>
    %1 = vector.shape_cast %0 : vector<1x8x96xbf16> to vector<8x96xbf16>
    %c0_2 = arith.constant 0 : index
    %c0_3 = arith.constant 0 : index
    %c0_4 = arith.constant 0 : index
    %2 = vector.load %arg3[%c0_2, %c0_3, %c0_4] : memref<1x8x96xbf16, #tpu.memory_space<vmem>>, vector<1x8x96xbf16>
    %3 = vector.shape_cast %2 : vector<1x8x96xbf16> to vector<8x96xbf16>
    %c0_5 = arith.constant 0 : index
    %c0_6 = arith.constant 0 : index
    %c0_7 = arith.constant 0 : index
    %4 = vector.load %arg4[%c0_5, %c0_6, %c0_7] : memref<1x1x8xf32, #tpu.memory_space<vmem>>, vector<1x1x8xf32>
    %5 = vector.shape_cast %4 : vector<1x1x8xf32> to vector<1x8xf32>
    %6 = vector.extract_strided_slice %1 {offsets = [0, 0], sizes = [8, 8], strides = [1, 1]} : vector<8x96xbf16> to vector<8x8xbf16>
    %7 = vector.extract_strided_slice %3 {offsets = [0, 32], sizes = [8, 8], strides = [1, 1]} : vector<8x96xbf16> to vector<8x8xbf16>
    %8 = vector.extract_strided_slice %3 {offsets = [0, 64], sizes = [8, 8], strides = [1, 1]} : vector<8x96xbf16> to vector<8x8xbf16>
    %9 = tpu.transpose %7, [1, 0] : vector<8x8xbf16> -> vector<8x8xbf16>
    %cst = arith.constant dense<0.000000e+00> : vector<8x8xf32>
    %10 = tpu.matmul %6, %9, %cst {dimension_numbers = #tpu.dot_dimension_numbers<[1], [0], [0], [1], [0, 0, 1, 1], [], []>} : vector<8x8xbf16>, vector<8x8xbf16>, vector<8x8xf32> -> vector<8x8xf32>
    %11 = vector.broadcast %5 : vector<1x8xf32> to vector<8x8xf32>
    %12 = arith.addf %10, %11 : vector<8x8xf32>
    %cst_8 = arith.constant dense<0xFF800000> : vector<8xf32>
    %13 = vector.multi_reduction <maximumf>, %12, %cst_8 [1] : vector<8x8xf32> to vector<8xf32>
    %14 = vector.shape_cast %13 : vector<8xf32> to vector<8x1xf32>
    %15 = vector.broadcast %14 : vector<8x1xf32> to vector<8x8xf32>
    %16 = arith.subf %12, %15 : vector<8x8xf32>
    %17 = math.exp %16 : vector<8x8xf32>
    %cst_9 = arith.constant dense<0.000000e+00> : vector<8xf32>
    %18 = vector.multi_reduction <add>, %17, %cst_9 [1] : vector<8x8xf32> to vector<8xf32>
    %19 = vector.shape_cast %18 : vector<8xf32> to vector<8x1xf32>
    %20 = tpu.reciprocal %19 {approx = true} : vector<8x1xf32> -> vector<8x1xf32>
    %21 = vector.broadcast %20 : vector<8x1xf32> to vector<8x8xf32>
    %22 = arith.mulf %17, %21 : vector<8x8xf32>
    %23 = arith.truncf %22 : vector<8x8xf32> to vector<8x8xbf16>
    %cst_10 = arith.constant dense<0.000000e+00> : vector<8x8xf32>
    %24 = tpu.matmul %23, %8, %cst_10 {dimension_numbers = #tpu.dot_dimension_numbers<[1], [0], [0], [1], [0, 0, 1, 1], [], []>} : vector<8x8xbf16>, vector<8x8xbf16>, vector<8x8xf32> -> vector<8x8xf32>
    %25 = vector.extract_strided_slice %1 {offsets = [0, 8], sizes = [8, 8], strides = [1, 1]} : vector<8x96xbf16> to vector<8x8xbf16>
    %26 = vector.extract_strided_slice %3 {offsets = [0, 40], sizes = [8, 8], strides = [1, 1]} : vector<8x96xbf16> to vector<8x8xbf16>
    %27 = vector.extract_strided_slice %3 {offsets = [0, 72], sizes = [8, 8], strides = [1, 1]} : vector<8x96xbf16> to vector<8x8xbf16>
    %28 = tpu.transpose %26, [1, 0] : vector<8x8xbf16> -> vector<8x8xbf16>
    %cst_11 = arith.constant dense<0.000000e+00> : vector<8x8xf32>
    %29 = tpu.matmul %25, %28, %cst_11 {dimension_numbers = #tpu.dot_dimension_numbers<[1], [0], [0], [1], [0, 0, 1, 1], [], []>} : vector<8x8xbf16>, vector<8x8xbf16>, vector<8x8xf32> -> vector<8x8xf32>
    %30 = vector.broadcast %5 : vector<1x8xf32> to vector<8x8xf32>
    %31 = arith.addf %29, %30 : vector<8x8xf32>
    %cst_12 = arith.constant dense<0xFF800000> : vector<8xf32>
    %32 = vector.multi_reduction <maximumf>, %31, %cst_12 [1] : vector<8x8xf32> to vector<8xf32>
    %33 = vector.shape_cast %32 : vector<8xf32> to vector<8x1xf32>
    %34 = vector.broadcast %33 : vector<8x1xf32> to vector<8x8xf32>
    %35 = arith.subf %31, %34 : vector<8x8xf32>
    %36 = math.exp %35 : vector<8x8xf32>
    %cst_13 = arith.constant dense<0.000000e+00> : vector<8xf32>
    %37 = vector.multi_reduction <add>, %36, %cst_13 [1] : vector<8x8xf32> to vector<8xf32>
    %38 = vector.shape_cast %37 : vector<8xf32> to vector<8x1xf32>
    %39 = tpu.reciprocal %38 {approx = true} : vector<8x1xf32> -> vector<8x1xf32>
    %40 = vector.broadcast %39 : vector<8x1xf32> to vector<8x8xf32>
    %41 = arith.mulf %36, %40 : vector<8x8xf32>
    %42 = arith.truncf %41 : vector<8x8xf32> to vector<8x8xbf16>
    %cst_14 = arith.constant dense<0.000000e+00> : vector<8x8xf32>
    %43 = tpu.matmul %42, %27, %cst_14 {dimension_numbers = #tpu.dot_dimension_numbers<[1], [0], [0], [1], [0, 0, 1, 1], [], []>} : vector<8x8xbf16>, vector<8x8xbf16>, vector<8x8xf32> -> vector<8x8xf32>
    %44 = vector.extract_strided_slice %1 {offsets = [0, 16], sizes = [8, 8], strides = [1, 1]} : vector<8x96xbf16> to vector<8x8xbf16>
    %45 = vector.extract_strided_slice %3 {offsets = [0, 48], sizes = [8, 8], strides = [1, 1]} : vector<8x96xbf16> to vector<8x8xbf16>
    %46 = vector.extract_strided_slice %3 {offsets = [0, 80], sizes = [8, 8], strides = [1, 1]} : vector<8x96xbf16> to vector<8x8xbf16>
    %47 = tpu.transpose %45, [1, 0] : vector<8x8xbf16> -> vector<8x8xbf16>
    %cst_15 = arith.constant dense<0.000000e+00> : vector<8x8xf32>
    %48 = tpu.matmul %44, %47, %cst_15 {dimension_numbers = #tpu.dot_dimension_numbers<[1], [0], [0], [1], [0, 0, 1, 1], [], []>} : vector<8x8xbf16>, vector<8x8xbf16>, vector<8x8xf32> -> vector<8x8xf32>
    %49 = vector.broadcast %5 : vector<1x8xf32> to vector<8x8xf32>
    %50 = arith.addf %48, %49 : vector<8x8xf32>
    %cst_16 = arith.constant dense<0xFF800000> : vector<8xf32>
    %51 = vector.multi_reduction <maximumf>, %50, %cst_16 [1] : vector<8x8xf32> to vector<8xf32>
    %52 = vector.shape_cast %51 : vector<8xf32> to vector<8x1xf32>
    %53 = vector.broadcast %52 : vector<8x1xf32> to vector<8x8xf32>
    %54 = arith.subf %50, %53 : vector<8x8xf32>
    %55 = math.exp %54 : vector<8x8xf32>
    %cst_17 = arith.constant dense<0.000000e+00> : vector<8xf32>
    %56 = vector.multi_reduction <add>, %55, %cst_17 [1] : vector<8x8xf32> to vector<8xf32>
    %57 = vector.shape_cast %56 : vector<8xf32> to vector<8x1xf32>
    %58 = tpu.reciprocal %57 {approx = true} : vector<8x1xf32> -> vector<8x1xf32>
    %59 = vector.broadcast %58 : vector<8x1xf32> to vector<8x8xf32>
    %60 = arith.mulf %55, %59 : vector<8x8xf32>
    %61 = arith.truncf %60 : vector<8x8xf32> to vector<8x8xbf16>
    %cst_18 = arith.constant dense<0.000000e+00> : vector<8x8xf32>
    %62 = tpu.matmul %61, %46, %cst_18 {dimension_numbers = #tpu.dot_dimension_numbers<[1], [0], [0], [1], [0, 0, 1, 1], [], []>} : vector<8x8xbf16>, vector<8x8xbf16>, vector<8x8xf32> -> vector<8x8xf32>
    %63 = vector.extract_strided_slice %1 {offsets = [0, 24], sizes = [8, 8], strides = [1, 1]} : vector<8x96xbf16> to vector<8x8xbf16>
    %64 = vector.extract_strided_slice %3 {offsets = [0, 56], sizes = [8, 8], strides = [1, 1]} : vector<8x96xbf16> to vector<8x8xbf16>
    %65 = vector.extract_strided_slice %3 {offsets = [0, 88], sizes = [8, 8], strides = [1, 1]} : vector<8x96xbf16> to vector<8x8xbf16>
    %66 = tpu.transpose %64, [1, 0] : vector<8x8xbf16> -> vector<8x8xbf16>
    %cst_19 = arith.constant dense<0.000000e+00> : vector<8x8xf32>
    %67 = tpu.matmul %63, %66, %cst_19 {dimension_numbers = #tpu.dot_dimension_numbers<[1], [0], [0], [1], [0, 0, 1, 1], [], []>} : vector<8x8xbf16>, vector<8x8xbf16>, vector<8x8xf32> -> vector<8x8xf32>
    %68 = vector.broadcast %5 : vector<1x8xf32> to vector<8x8xf32>
    %69 = arith.addf %67, %68 : vector<8x8xf32>
    %cst_20 = arith.constant dense<0xFF800000> : vector<8xf32>
    %70 = vector.multi_reduction <maximumf>, %69, %cst_20 [1] : vector<8x8xf32> to vector<8xf32>
    %71 = vector.shape_cast %70 : vector<8xf32> to vector<8x1xf32>
    %72 = vector.broadcast %71 : vector<8x1xf32> to vector<8x8xf32>
    %73 = arith.subf %69, %72 : vector<8x8xf32>
    %74 = math.exp %73 : vector<8x8xf32>
    %cst_21 = arith.constant dense<0.000000e+00> : vector<8xf32>
    %75 = vector.multi_reduction <add>, %74, %cst_21 [1] : vector<8x8xf32> to vector<8xf32>
    %76 = vector.shape_cast %75 : vector<8xf32> to vector<8x1xf32>
    %77 = tpu.reciprocal %76 {approx = true} : vector<8x1xf32> -> vector<8x1xf32>
    %78 = vector.broadcast %77 : vector<8x1xf32> to vector<8x8xf32>
    %79 = arith.mulf %74, %78 : vector<8x8xf32>
    %80 = arith.truncf %79 : vector<8x8xf32> to vector<8x8xbf16>
    %cst_22 = arith.constant dense<0.000000e+00> : vector<8x8xf32>
    %81 = tpu.matmul %80, %65, %cst_22 {dimension_numbers = #tpu.dot_dimension_numbers<[1], [0], [0], [1], [0, 0, 1, 1], [], []>} : vector<8x8xbf16>, vector<8x8xbf16>, vector<8x8xf32> -> vector<8x8xf32>
    %82 = tpu.concatenate %24, %43, %62, %81 in 1 : vector<8x8xf32>, vector<8x8xf32>, vector<8x8xf32>, vector<8x8xf32> -> vector<8x32xf32>
    %83 = vector.shape_cast %82 : vector<8x32xf32> to vector<1x8x32xf32>
    %84 = arith.truncf %83 : vector<1x8x32xf32> to vector<1x8x32xbf16>
    %c0_23 = arith.constant 0 : index
    %c0_24 = arith.constant 0 : index
    %c0_25 = arith.constant 0 : index
    %85 = vector.load %arg5[%c0_23, %c0_24, %c0_25] : memref<1x8x32xbf16, #tpu.memory_space<vmem>>, vector<1x8x32xbf16>
    tpu.vector_store %arg5[%c0_23, %c0_24, %c0_25], %84 {strides = array<i32>} : memref<1x8x32xbf16, #tpu.memory_space<vmem>>, vector<1x8x32xbf16>,
    return
  }
  func.func @transform_0(%arg0: i32, %arg1: i32) -> (i32, i32, i32) {
    %c0_i32 = arith.constant 0 : i32
    %c0_i32_0 = arith.constant 0 : i32
    return %arg0, %arg1, %c0_i32 : i32, i32, i32
  }
  func.func @transform_1(%arg0: i32, %arg1: i32) -> (i32, i32, i32) {
    %c0_i32 = arith.constant 0 : i32
    %c0_i32_0 = arith.constant 0 : i32
    %c0_i32_1 = arith.constant 0 : i32
    return %arg0, %c0_i32, %c0_i32_0 : i32, i32, i32
  }
  func.func @transform_2(%arg0: i32, %arg1: i32) -> (i32, i32, i32) {
    %c0_i32 = arith.constant 0 : i32
    %c0_i32_0 = arith.constant 0 : i32
    %c0_i32_1 = arith.constant 0 : i32
    return %arg0, %c0_i32, %c0_i32_0 : i32, i32, i32
  }
  func.func @transform_3(%arg0: i32, %arg1: i32) -> (i32, i32, i32) {
    %c0_i32 = arith.constant 0 : i32
    %c0_i32_0 = arith.constant 0 : i32
    return %arg0, %arg1, %c0_i32 : i32, i32, i32
  }
}

module attributes {stable_mosaic.version = 11 : i64} {
  func.func @_matmul_residual_ln_kernel(%arg0: i32, %arg1: i32, %arg2: memref<16x32xbf16, #tpu.memory_space<vmem>>, %arg3: memref<32x32xbf16, #tpu.memory_space<vmem>>, %arg4: memref<1x32xf32, #tpu.memory_space<vmem>>, %arg5: memref<16x32xbf16, #tpu.memory_space<vmem>>, %arg6: memref<1x32xf32, #tpu.memory_space<vmem>>, %arg7: memref<1x32xf32, #tpu.memory_space<vmem>>, %arg8: memref<16x32xbf16, #tpu.memory_space<vmem>>, %arg9: memref<16x32xf32, #tpu.memory_space<vmem>>) attributes {dimension_semantics = [#tpu.dimension_semantics<parallel>, #tpu.dimension_semantics<arbitrary>], iteration_bounds = array<i64: 1, 1>, scalar_prefetch = 0 : i64, scratch_operands = 1 : i64, tpu.core_type = #tpu.core_type<tc>, window_params = [{transform_indices = @transform_0, window_bounds = array<i64: 16, 32>}, {transform_indices = @transform_1, window_bounds = array<i64: 32, 32>}, {pipeline_mode = #tpu.pipeline_mode<synchronous>, transform_indices = @transform_2, window_bounds = array<i64: 1, 32>}, {transform_indices = @transform_3, window_bounds = array<i64: 16, 32>}, {pipeline_mode = #tpu.pipeline_mode<synchronous>, transform_indices = @transform_4, window_bounds = array<i64: 1, 32>}, {pipeline_mode = #tpu.pipeline_mode<synchronous>, transform_indices = @transform_5, window_bounds = array<i64: 1, 32>}, {transform_indices = @transform_6, window_bounds = array<i64: 16, 32>}]} {
    %c0_i32 = arith.constant 0 : i32
    %0 = arith.cmpi eq, %arg1, %c0_i32 : i32
    %1 = arith.extui %0 : i1 to i32
    %c0_i32_0 = arith.constant 0 : i32
    %2 = arith.cmpi ne, %1, %c0_i32_0 : i32
    scf.if %2 {
      %cst_10 = arith.constant 0.000000e+00 : f32
      %12 = vector.broadcast %cst_10 : f32 to vector<16x32xf32>
      %c0_11 = arith.constant 0 : index
      %c0_12 = arith.constant 0 : index
      %13 = vector.load %arg9[%c0_11, %c0_12] : memref<16x32xf32, #tpu.memory_space<vmem>>, vector<16x32xf32>
      tpu.vector_store %arg9[%c0_11, %c0_12], %12 {strides = array<i32>} : memref<16x32xf32, #tpu.memory_space<vmem>>, vector<16x32xf32>,
    } else {
    }
    %c0 = arith.constant 0 : index
    %c0_1 = arith.constant 0 : index
    %3 = vector.load %arg9[%c0, %c0_1] : memref<16x32xf32, #tpu.memory_space<vmem>>, vector<16x32xf32>
    %c0_2 = arith.constant 0 : index
    %c0_3 = arith.constant 0 : index
    %4 = vector.load %arg2[%c0_2, %c0_3] : memref<16x32xbf16, #tpu.memory_space<vmem>>, vector<16x32xbf16>
    %c0_4 = arith.constant 0 : index
    %c0_5 = arith.constant 0 : index
    %5 = vector.load %arg3[%c0_4, %c0_5] : memref<32x32xbf16, #tpu.memory_space<vmem>>, vector<32x32xbf16>
    %cst = arith.constant dense<0.000000e+00> : vector<16x32xf32>
    %6 = tpu.matmul %4, %5, %cst {dimension_numbers = #tpu.dot_dimension_numbers<[1], [0], [0], [1], [0, 0, 1, 1], [], []>} : vector<16x32xbf16>, vector<32x32xbf16>, vector<16x32xf32> -> vector<16x32xf32>
    %7 = arith.addf %3, %6 : vector<16x32xf32>
    %c0_6 = arith.constant 0 : index
    %c0_7 = arith.constant 0 : index
    %8 = vector.load %arg9[%c0_6, %c0_7] : memref<16x32xf32, #tpu.memory_space<vmem>>, vector<16x32xf32>
    tpu.vector_store %arg9[%c0_6, %c0_7], %7 {strides = array<i32>} : memref<16x32xf32, #tpu.memory_space<vmem>>, vector<16x32xf32>,
    %c0_i32_8 = arith.constant 0 : i32
    %9 = arith.cmpi eq, %arg1, %c0_i32_8 : i32
    %10 = arith.extui %9 : i1 to i32
    %c0_i32_9 = arith.constant 0 : i32
    %11 = arith.cmpi ne, %10, %c0_i32_9 : i32
    scf.if %11 {
      %c0_10 = arith.constant 0 : index
      %c0_11 = arith.constant 0 : index
      %12 = vector.load %arg9[%c0_10, %c0_11] : memref<16x32xf32, #tpu.memory_space<vmem>>, vector<16x32xf32>
      %c0_12 = arith.constant 0 : index
      %c0_13 = arith.constant 0 : index
      %13 = vector.load %arg4[%c0_12, %c0_13] : memref<1x32xf32, #tpu.memory_space<vmem>>, vector<1x32xf32>
      %14 = vector.broadcast %13 : vector<1x32xf32> to vector<16x32xf32>
      %15 = arith.addf %12, %14 : vector<16x32xf32>
      %c0_14 = arith.constant 0 : index
      %c0_15 = arith.constant 0 : index
      %16 = vector.load %arg5[%c0_14, %c0_15] : memref<16x32xbf16, #tpu.memory_space<vmem>>, vector<16x32xbf16>
      %17 = arith.extf %16 : vector<16x32xbf16> to vector<16x32xf32>
      %18 = arith.addf %15, %17 : vector<16x32xf32>
      %cst_16 = arith.constant dense<0.000000e+00> : vector<16xf32>
      %19 = vector.multi_reduction <add>, %18, %cst_16 [1] : vector<16x32xf32> to vector<16xf32>
      %20 = vector.shape_cast %19 : vector<16xf32> to vector<16x1xf32>
      %cst_17 = arith.constant 3.200000e+01 : f32
      %21 = vector.broadcast %cst_17 : f32 to vector<16x1xf32>
      %22 = arith.divf %20, %21 : vector<16x1xf32>
      %23 = vector.broadcast %22 : vector<16x1xf32> to vector<16x32xf32>
      %24 = arith.subf %18, %23 : vector<16x32xf32>
      %25 = vector.broadcast %22 : vector<16x1xf32> to vector<16x32xf32>
      %26 = arith.subf %18, %25 : vector<16x32xf32>
      %27 = arith.mulf %24, %26 : vector<16x32xf32>
      %cst_18 = arith.constant dense<0.000000e+00> : vector<16xf32>
      %28 = vector.multi_reduction <add>, %27, %cst_18 [1] : vector<16x32xf32> to vector<16xf32>
      %29 = vector.shape_cast %28 : vector<16xf32> to vector<16x1xf32>
      %cst_19 = arith.constant 3.200000e+01 : f32
      %30 = vector.broadcast %cst_19 : f32 to vector<16x1xf32>
      %31 = arith.divf %29, %30 : vector<16x1xf32>
      %32 = vector.broadcast %22 : vector<16x1xf32> to vector<16x32xf32>
      %33 = arith.subf %18, %32 : vector<16x32xf32>
      %cst_20 = arith.constant 9.99999996E-13 : f32
      %34 = vector.broadcast %cst_20 : f32 to vector<16x1xf32>
      %35 = arith.addf %31, %34 : vector<16x1xf32>
      %36 = math.rsqrt %35 : vector<16x1xf32>
      %37 = vector.broadcast %36 : vector<16x1xf32> to vector<16x32xf32>
      %38 = arith.mulf %33, %37 : vector<16x32xf32>
      %c0_21 = arith.constant 0 : index
      %c0_22 = arith.constant 0 : index
      %39 = vector.load %arg6[%c0_21, %c0_22] : memref<1x32xf32, #tpu.memory_space<vmem>>, vector<1x32xf32>
      %40 = vector.broadcast %39 : vector<1x32xf32> to vector<16x32xf32>
      %41 = arith.mulf %38, %40 : vector<16x32xf32>
      %c0_23 = arith.constant 0 : index
      %c0_24 = arith.constant 0 : index
      %42 = vector.load %arg7[%c0_23, %c0_24] : memref<1x32xf32, #tpu.memory_space<vmem>>, vector<1x32xf32>
      %43 = vector.broadcast %42 : vector<1x32xf32> to vector<16x32xf32>
      %44 = arith.addf %41, %43 : vector<16x32xf32>
      %45 = arith.truncf %44 : vector<16x32xf32> to vector<16x32xbf16>
      %c0_25 = arith.constant 0 : index
      %c0_26 = arith.constant 0 : index
      %46 = vector.load %arg8[%c0_25, %c0_26] : memref<16x32xbf16, #tpu.memory_space<vmem>>, vector<16x32xbf16>
      tpu.vector_store %arg8[%c0_25, %c0_26], %45 {strides = array<i32>} : memref<16x32xbf16, #tpu.memory_space<vmem>>, vector<16x32xbf16>,
    } else {
    }
    return
  }
  func.func @transform_0(%arg0: i32, %arg1: i32) -> (i32, i32) {
    %c0_i32 = arith.constant 0 : i32
    return %arg0, %arg1 : i32, i32
  }
  func.func @transform_1(%arg0: i32, %arg1: i32) -> (i32, i32) {
    %c0_i32 = arith.constant 0 : i32
    %c0_i32_0 = arith.constant 0 : i32
    return %arg1, %c0_i32 : i32, i32
  }
  func.func @transform_2(%arg0: i32, %arg1: i32) -> (i32, i32) {
    %c0_i32 = arith.constant 0 : i32
    %c0_i32_0 = arith.constant 0 : i32
    %c0_i32_1 = arith.constant 0 : i32
    return %c0_i32, %c0_i32_0 : i32, i32
  }
  func.func @transform_3(%arg0: i32, %arg1: i32) -> (i32, i32) {
    %c0_i32 = arith.constant 0 : i32
    %c0_i32_0 = arith.constant 0 : i32
    return %arg0, %c0_i32 : i32, i32
  }
  func.func @transform_4(%arg0: i32, %arg1: i32) -> (i32, i32) {
    %c0_i32 = arith.constant 0 : i32
    %c0_i32_0 = arith.constant 0 : i32
    %c0_i32_1 = arith.constant 0 : i32
    return %c0_i32, %c0_i32_0 : i32, i32
  }
  func.func @transform_5(%arg0: i32, %arg1: i32) -> (i32, i32) {
    %c0_i32 = arith.constant 0 : i32
    %c0_i32_0 = arith.constant 0 : i32
    %c0_i32_1 = arith.constant 0 : i32
    return %c0_i32, %c0_i32_0 : i32, i32
  }
  func.func @transform_6(%arg0: i32, %arg1: i32) -> (i32, i32) {
    %c0_i32 = arith.constant 0 : i32
    %c0_i32_0 = arith.constant 0 : i32
    return %arg0, %c0_i32 : i32, i32
  }
}

module attributes {stable_mosaic.version = 11 : i64} {
  func.func @_matmul_bias_act_kernel(%arg0: i32, %arg1: i32, %arg2: i32, %arg3: memref<16x32xbf16, #tpu.memory_space<vmem>>, %arg4: memref<32x128xbf16, #tpu.memory_space<vmem>>, %arg5: memref<1x128xf32, #tpu.memory_space<vmem>>, %arg6: memref<16x128xbf16, #tpu.memory_space<vmem>>, %arg7: memref<16x128xf32, #tpu.memory_space<vmem>>) attributes {dimension_semantics = [#tpu.dimension_semantics<parallel>, #tpu.dimension_semantics<parallel>, #tpu.dimension_semantics<arbitrary>], iteration_bounds = array<i64: 1, 1, 1>, scalar_prefetch = 0 : i64, scratch_operands = 1 : i64, tpu.core_type = #tpu.core_type<tc>, window_params = [{transform_indices = @transform_0, window_bounds = array<i64: 16, 32>}, {transform_indices = @transform_1, window_bounds = array<i64: 32, 128>}, {transform_indices = @transform_2, window_bounds = array<i64: 1, 128>}, {transform_indices = @transform_3, window_bounds = array<i64: 16, 128>}]} {
    %c0_i32 = arith.constant 0 : i32
    %0 = arith.cmpi eq, %arg2, %c0_i32 : i32
    %1 = arith.extui %0 : i1 to i32
    %c0_i32_0 = arith.constant 0 : i32
    %2 = arith.cmpi ne, %1, %c0_i32_0 : i32
    scf.if %2 {
      %cst_10 = arith.constant 0.000000e+00 : f32
      %12 = vector.broadcast %cst_10 : f32 to vector<16x128xf32>
      %c0_11 = arith.constant 0 : index
      %c0_12 = arith.constant 0 : index
      %13 = vector.load %arg7[%c0_11, %c0_12] : memref<16x128xf32, #tpu.memory_space<vmem>>, vector<16x128xf32>
      tpu.vector_store %arg7[%c0_11, %c0_12], %12 {strides = array<i32>} : memref<16x128xf32, #tpu.memory_space<vmem>>, vector<16x128xf32>,
    } else {
    }
    %c0 = arith.constant 0 : index
    %c0_1 = arith.constant 0 : index
    %3 = vector.load %arg7[%c0, %c0_1] : memref<16x128xf32, #tpu.memory_space<vmem>>, vector<16x128xf32>
    %c0_2 = arith.constant 0 : index
    %c0_3 = arith.constant 0 : index
    %4 = vector.load %arg3[%c0_2, %c0_3] : memref<16x32xbf16, #tpu.memory_space<vmem>>, vector<16x32xbf16>
    %c0_4 = arith.constant 0 : index
    %c0_5 = arith.constant 0 : index
    %5 = vector.load %arg4[%c0_4, %c0_5] : memref<32x128xbf16, #tpu.memory_space<vmem>>, vector<32x128xbf16>
    %cst = arith.constant dense<0.000000e+00> : vector<16x128xf32>
    %6 = tpu.matmul %4, %5, %cst {dimension_numbers = #tpu.dot_dimension_numbers<[1], [0], [0], [1], [0, 0, 1, 1], [], []>} : vector<16x32xbf16>, vector<32x128xbf16>, vector<16x128xf32> -> vector<16x128xf32>
    %7 = arith.addf %3, %6 : vector<16x128xf32>
    %c0_6 = arith.constant 0 : index
    %c0_7 = arith.constant 0 : index
    %8 = vector.load %arg7[%c0_6, %c0_7] : memref<16x128xf32, #tpu.memory_space<vmem>>, vector<16x128xf32>
    tpu.vector_store %arg7[%c0_6, %c0_7], %7 {strides = array<i32>} : memref<16x128xf32, #tpu.memory_space<vmem>>, vector<16x128xf32>,
    %c0_i32_8 = arith.constant 0 : i32
    %9 = arith.cmpi eq, %arg2, %c0_i32_8 : i32
    %10 = arith.extui %9 : i1 to i32
    %c0_i32_9 = arith.constant 0 : i32
    %11 = arith.cmpi ne, %10, %c0_i32_9 : i32
    scf.if %11 {
      %c0_10 = arith.constant 0 : index
      %c0_11 = arith.constant 0 : index
      %12 = vector.load %arg7[%c0_10, %c0_11] : memref<16x128xf32, #tpu.memory_space<vmem>>, vector<16x128xf32>
      %c0_12 = arith.constant 0 : index
      %c0_13 = arith.constant 0 : index
      %13 = vector.load %arg5[%c0_12, %c0_13] : memref<1x128xf32, #tpu.memory_space<vmem>>, vector<1x128xf32>
      %14 = vector.broadcast %13 : vector<1x128xf32> to vector<16x128xf32>
      %15 = arith.addf %12, %14 : vector<16x128xf32>
      %cst_14 = arith.constant 5.000000e-01 : f32
      %16 = vector.broadcast %cst_14 : f32 to vector<16x128xf32>
      %17 = arith.mulf %16, %15 : vector<16x128xf32>
      %cst_15 = arith.constant 4.471500e-02 : f32
      %18 = vector.broadcast %cst_15 : f32 to vector<16x128xf32>
      %19 = arith.mulf %18, %15 : vector<16x128xf32>
      %20 = arith.mulf %19, %15 : vector<16x128xf32>
      %21 = arith.mulf %20, %15 : vector<16x128xf32>
      %22 = arith.addf %15, %21 : vector<16x128xf32>
      %cst_16 = arith.constant 0.797884583 : f32
      %23 = vector.broadcast %cst_16 : f32 to vector<16x128xf32>
      %24 = arith.mulf %23, %22 : vector<16x128xf32>
      %25 = math.tanh %24 : vector<16x128xf32>
      %cst_17 = arith.constant 1.000000e+00 : f32
      %26 = vector.broadcast %cst_17 : f32 to vector<16x128xf32>
      %27 = arith.addf %26, %25 : vector<16x128xf32>
      %28 = arith.mulf %17, %27 : vector<16x128xf32>
      %29 = arith.truncf %28 : vector<16x128xf32> to vector<16x128xbf16>
      %c0_18 = arith.constant 0 : index
      %c0_19 = arith.constant 0 : index
      %30 = vector.load %arg6[%c0_18, %c0_19] : memref<16x128xbf16, #tpu.memory_space<vmem>>, vector<16x128xbf16>
      tpu.vector_store %arg6[%c0_18, %c0_19], %29 {strides = array<i32>} : memref<16x128xbf16, #tpu.memory_space<vmem>>, vector<16x128xbf16>,
    } else {
    }
    return
  }
  func.func @transform_0(%arg0: i32, %arg1: i32, %arg2: i32) -> (i32, i32) {
    %c0_i32 = arith.constant 0 : i32
    return %arg0, %arg2 : i32, i32
  }
  func.func @transform_1(%arg0: i32, %arg1: i32, %arg2: i32) -> (i32, i32) {
    %c0_i32 = arith.constant 0 : i32
    return %arg2, %arg1 : i32, i32
  }
  func.func @transform_2(%arg0: i32, %arg1: i32, %arg2: i32) -> (i32, i32) {
    %c0_i32 = arith.constant 0 : i32
    %c0_i32_0 = arith.constant 0 : i32
    return %c0_i32, %arg1 : i32, i32
  }
  func.func @transform_3(%arg0: i32, %arg1: i32, %arg2: i32) -> (i32, i32) {
    %c0_i32 = arith.constant 0 : i32
    return %arg0, %arg1 : i32, i32
  }
}

module attributes {stable_mosaic.version = 11 : i64} {
  func.func @_matmul_residual_ln_kernel(%arg0: i32, %arg1: i32, %arg2: memref<16x128xbf16, #tpu.memory_space<vmem>>, %arg3: memref<128x32xbf16, #tpu.memory_space<vmem>>, %arg4: memref<1x32xf32, #tpu.memory_space<vmem>>, %arg5: memref<16x32xbf16, #tpu.memory_space<vmem>>, %arg6: memref<1x32xf32, #tpu.memory_space<vmem>>, %arg7: memref<1x32xf32, #tpu.memory_space<vmem>>, %arg8: memref<16x32xbf16, #tpu.memory_space<vmem>>, %arg9: memref<16x32xf32, #tpu.memory_space<vmem>>) attributes {dimension_semantics = [#tpu.dimension_semantics<parallel>, #tpu.dimension_semantics<arbitrary>], iteration_bounds = array<i64: 1, 1>, scalar_prefetch = 0 : i64, scratch_operands = 1 : i64, tpu.core_type = #tpu.core_type<tc>, window_params = [{transform_indices = @transform_0, window_bounds = array<i64: 16, 128>}, {transform_indices = @transform_1, window_bounds = array<i64: 128, 32>}, {pipeline_mode = #tpu.pipeline_mode<synchronous>, transform_indices = @transform_2, window_bounds = array<i64: 1, 32>}, {transform_indices = @transform_3, window_bounds = array<i64: 16, 32>}, {pipeline_mode = #tpu.pipeline_mode<synchronous>, transform_indices = @transform_4, window_bounds = array<i64: 1, 32>}, {pipeline_mode = #tpu.pipeline_mode<synchronous>, transform_indices = @transform_5, window_bounds = array<i64: 1, 32>}, {transform_indices = @transform_6, window_bounds = array<i64: 16, 32>}]} {
    %c0_i32 = arith.constant 0 : i32
    %0 = arith.cmpi eq, %arg1, %c0_i32 : i32
    %1 = arith.extui %0 : i1 to i32
    %c0_i32_0 = arith.constant 0 : i32
    %2 = arith.cmpi ne, %1, %c0_i32_0 : i32
    scf.if %2 {
      %cst_10 = arith.constant 0.000000e+00 : f32
      %12 = vector.broadcast %cst_10 : f32 to vector<16x32xf32>
      %c0_11 = arith.constant 0 : index
      %c0_12 = arith.constant 0 : index
      %13 = vector.load %arg9[%c0_11, %c0_12] : memref<16x32xf32, #tpu.memory_space<vmem>>, vector<16x32xf32>
      tpu.vector_store %arg9[%c0_11, %c0_12], %12 {strides = array<i32>} : memref<16x32xf32, #tpu.memory_space<vmem>>, vector<16x32xf32>,
    } else {
    }
    %c0 = arith.constant 0 : index
    %c0_1 = arith.constant 0 : index
    %3 = vector.load %arg9[%c0, %c0_1] : memref<16x32xf32, #tpu.memory_space<vmem>>, vector<16x32xf32>
    %c0_2 = arith.constant 0 : index
    %c0_3 = arith.constant 0 : index
    %4 = vector.load %arg2[%c0_2, %c0_3] : memref<16x128xbf16, #tpu.memory_space<vmem>>, vector<16x128xbf16>
    %c0_4 = arith.constant 0 : index
    %c0_5 = arith.constant 0 : index
    %5 = vector.load %arg3[%c0_4, %c0_5] : memref<128x32xbf16, #tpu.memory_space<vmem>>, vector<128x32xbf16>
    %cst = arith.constant dense<0.000000e+00> : vector<16x32xf32>
    %6 = tpu.matmul %4, %5, %cst {dimension_numbers = #tpu.dot_dimension_numbers<[1], [0], [0], [1], [0, 0, 1, 1], [], []>} : vector<16x128xbf16>, vector<128x32xbf16>, vector<16x32xf32> -> vector<16x32xf32>
    %7 = arith.addf %3, %6 : vector<16x32xf32>
    %c0_6 = arith.constant 0 : index
    %c0_7 = arith.constant 0 : index
    %8 = vector.load %arg9[%c0_6, %c0_7] : memref<16x32xf32, #tpu.memory_space<vmem>>, vector<16x32xf32>
    tpu.vector_store %arg9[%c0_6, %c0_7], %7 {strides = array<i32>} : memref<16x32xf32, #tpu.memory_space<vmem>>, vector<16x32xf32>,
    %c0_i32_8 = arith.constant 0 : i32
    %9 = arith.cmpi eq, %arg1, %c0_i32_8 : i32
    %10 = arith.extui %9 : i1 to i32
    %c0_i32_9 = arith.constant 0 : i32
    %11 = arith.cmpi ne, %10, %c0_i32_9 : i32
    scf.if %11 {
      %c0_10 = arith.constant 0 : index
      %c0_11 = arith.constant 0 : index
      %12 = vector.load %arg9[%c0_10, %c0_11] : memref<16x32xf32, #tpu.memory_space<vmem>>, vector<16x32xf32>
      %c0_12 = arith.constant 0 : index
      %c0_13 = arith.constant 0 : index
      %13 = vector.load %arg4[%c0_12, %c0_13] : memref<1x32xf32, #tpu.memory_space<vmem>>, vector<1x32xf32>
      %14 = vector.broadcast %13 : vector<1x32xf32> to vector<16x32xf32>
      %15 = arith.addf %12, %14 : vector<16x32xf32>
      %c0_14 = arith.constant 0 : index
      %c0_15 = arith.constant 0 : index
      %16 = vector.load %arg5[%c0_14, %c0_15] : memref<16x32xbf16, #tpu.memory_space<vmem>>, vector<16x32xbf16>
      %17 = arith.extf %16 : vector<16x32xbf16> to vector<16x32xf32>
      %18 = arith.addf %15, %17 : vector<16x32xf32>
      %cst_16 = arith.constant dense<0.000000e+00> : vector<16xf32>
      %19 = vector.multi_reduction <add>, %18, %cst_16 [1] : vector<16x32xf32> to vector<16xf32>
      %20 = vector.shape_cast %19 : vector<16xf32> to vector<16x1xf32>
      %cst_17 = arith.constant 3.200000e+01 : f32
      %21 = vector.broadcast %cst_17 : f32 to vector<16x1xf32>
      %22 = arith.divf %20, %21 : vector<16x1xf32>
      %23 = vector.broadcast %22 : vector<16x1xf32> to vector<16x32xf32>
      %24 = arith.subf %18, %23 : vector<16x32xf32>
      %25 = vector.broadcast %22 : vector<16x1xf32> to vector<16x32xf32>
      %26 = arith.subf %18, %25 : vector<16x32xf32>
      %27 = arith.mulf %24, %26 : vector<16x32xf32>
      %cst_18 = arith.constant dense<0.000000e+00> : vector<16xf32>
      %28 = vector.multi_reduction <add>, %27, %cst_18 [1] : vector<16x32xf32> to vector<16xf32>
      %29 = vector.shape_cast %28 : vector<16xf32> to vector<16x1xf32>
      %cst_19 = arith.constant 3.200000e+01 : f32
      %30 = vector.broadcast %cst_19 : f32 to vector<16x1xf32>
      %31 = arith.divf %29, %30 : vector<16x1xf32>
      %32 = vector.broadcast %22 : vector<16x1xf32> to vector<16x32xf32>
      %33 = arith.subf %18, %32 : vector<16x32xf32>
      %cst_20 = arith.constant 9.99999996E-13 : f32
      %34 = vector.broadcast %cst_20 : f32 to vector<16x1xf32>
      %35 = arith.addf %31, %34 : vector<16x1xf32>
      %36 = math.rsqrt %35 : vector<16x1xf32>
      %37 = vector.broadcast %36 : vector<16x1xf32> to vector<16x32xf32>
      %38 = arith.mulf %33, %37 : vector<16x32xf32>
      %c0_21 = arith.constant 0 : index
      %c0_22 = arith.constant 0 : index
      %39 = vector.load %arg6[%c0_21, %c0_22] : memref<1x32xf32, #tpu.memory_space<vmem>>, vector<1x32xf32>
      %40 = vector.broadcast %39 : vector<1x32xf32> to vector<16x32xf32>
      %41 = arith.mulf %38, %40 : vector<16x32xf32>
      %c0_23 = arith.constant 0 : index
      %c0_24 = arith.constant 0 : index
      %42 = vector.load %arg7[%c0_23, %c0_24] : memref<1x32xf32, #tpu.memory_space<vmem>>, vector<1x32xf32>
      %43 = vector.broadcast %42 : vector<1x32xf32> to vector<16x32xf32>
      %44 = arith.addf %41, %43 : vector<16x32xf32>
      %45 = arith.truncf %44 : vector<16x32xf32> to vector<16x32xbf16>
      %c0_25 = arith.constant 0 : index
      %c0_26 = arith.constant 0 : index
      %46 = vector.load %arg8[%c0_25, %c0_26] : memref<16x32xbf16, #tpu.memory_space<vmem>>, vector<16x32xbf16>
      tpu.vector_store %arg8[%c0_25, %c0_26], %45 {strides = array<i32>} : memref<16x32xbf16, #tpu.memory_space<vmem>>, vector<16x32xbf16>,
    } else {
    }
    return
  }
  func.func @transform_0(%arg0: i32, %arg1: i32) -> (i32, i32) {
    %c0_i32 = arith.constant 0 : i32
    return %arg0, %arg1 : i32, i32
  }
  func.func @transform_1(%arg0: i32, %arg1: i32) -> (i32, i32) {
    %c0_i32 = arith.constant 0 : i32
    %c0_i32_0 = arith.constant 0 : i32
    return %arg1, %c0_i32 : i32, i32
  }
  func.func @transform_2(%arg0: i32, %arg1: i32) -> (i32, i32) {
    %c0_i32 = arith.constant 0 : i32
    %c0_i32_0 = arith.constant 0 : i32
    %c0_i32_1 = arith.constant 0 : i32
    return %c0_i32, %c0_i32_0 : i32, i32
  }
  func.func @transform_3(%arg0: i32, %arg1: i32) -> (i32, i32) {
    %c0_i32 = arith.constant 0 : i32
    %c0_i32_0 = arith.constant 0 : i32
    return %arg0, %c0_i32 : i32, i32
  }
  func.func @transform_4(%arg0: i32, %arg1: i32) -> (i32, i32) {
    %c0_i32 = arith.constant 0 : i32
    %c0_i32_0 = arith.constant 0 : i32
    %c0_i32_1 = arith.constant 0 : i32
    return %c0_i32, %c0_i32_0 : i32, i32
  }
  func.func @transform_5(%arg0: i32, %arg1: i32) -> (i32, i32) {
    %c0_i32 = arith.constant 0 : i32
    %c0_i32_0 = arith.constant 0 : i32
    %c0_i32_1 = arith.constant 0 : i32
    return %c0_i32, %c0_i32_0 : i32, i32
  }
  func.func @transform_6(%arg0: i32, %arg1: i32) -> (i32, i32) {
    %c0_i32 = arith.constant 0 : i32
    %c0_i32_0 = arith.constant 0 : i32
    return %arg0, %c0_i32 : i32, i32
  }
}

module attributes {stable_mosaic.version = 11 : i64} {
  func.func @_head_kernel(%arg0: i32, %arg1: memref<2x32xbf16, #tpu.memory_space<vmem>>, %arg2: memref<32x32xbf16, #tpu.memory_space<vmem>>, %arg3: memref<1x32xf32, #tpu.memory_space<vmem>>, %arg4: memref<32x32xbf16, #tpu.memory_space<vmem>>, %arg5: memref<1x32xf32, #tpu.memory_space<vmem>>, %arg6: memref<32x128xbf16, #tpu.memory_space<vmem>>, %arg7: memref<1x128xf32, #tpu.memory_space<vmem>>, %arg8: memref<2x128xf32, #tpu.memory_space<vmem>>) attributes {dimension_semantics = [#tpu.dimension_semantics<parallel>], iteration_bounds = array<i64: 1>, scalar_prefetch = 0 : i64, scratch_operands = 0 : i64, tpu.core_type = #tpu.core_type<tc>, window_params = [{transform_indices = @transform_0, window_bounds = array<i64: 2, 32>}, {pipeline_mode = #tpu.pipeline_mode<synchronous>, transform_indices = @transform_1, window_bounds = array<i64: 32, 32>}, {pipeline_mode = #tpu.pipeline_mode<synchronous>, transform_indices = @transform_2, window_bounds = array<i64: 1, 32>}, {pipeline_mode = #tpu.pipeline_mode<synchronous>, transform_indices = @transform_3, window_bounds = array<i64: 32, 32>}, {pipeline_mode = #tpu.pipeline_mode<synchronous>, transform_indices = @transform_4, window_bounds = array<i64: 1, 32>}, {pipeline_mode = #tpu.pipeline_mode<synchronous>, transform_indices = @transform_5, window_bounds = array<i64: 32, 128>}, {pipeline_mode = #tpu.pipeline_mode<synchronous>, transform_indices = @transform_6, window_bounds = array<i64: 1, 128>}, {transform_indices = @transform_7, window_bounds = array<i64: 2, 128>}]} {
    %c0 = arith.constant 0 : index
    %c0_0 = arith.constant 0 : index
    %0 = vector.load %arg1[%c0, %c0_0] : memref<2x32xbf16, #tpu.memory_space<vmem>>, vector<2x32xbf16>
    %c0_1 = arith.constant 0 : index
    %c0_2 = arith.constant 0 : index
    %1 = vector.load %arg2[%c0_1, %c0_2] : memref<32x32xbf16, #tpu.memory_space<vmem>>, vector<32x32xbf16>
    %cst = arith.constant dense<0.000000e+00> : vector<2x32xf32>
    %2 = tpu.matmul %0, %1, %cst {dimension_numbers = #tpu.dot_dimension_numbers<[1], [0], [0], [1], [0, 0, 1, 1], [], []>} : vector<2x32xbf16>, vector<32x32xbf16>, vector<2x32xf32> -> vector<2x32xf32>
    %c0_3 = arith.constant 0 : index
    %c0_4 = arith.constant 0 : index
    %3 = vector.load %arg3[%c0_3, %c0_4] : memref<1x32xf32, #tpu.memory_space<vmem>>, vector<1x32xf32>
    %4 = vector.broadcast %3 : vector<1x32xf32> to vector<2x32xf32>
    %5 = arith.addf %2, %4 : vector<2x32xf32>
    %6 = math.tanh %5 : vector<2x32xf32>
    %7 = arith.truncf %6 : vector<2x32xf32> to vector<2x32xbf16>
    %c0_5 = arith.constant 0 : index
    %c0_6 = arith.constant 0 : index
    %8 = vector.load %arg4[%c0_5, %c0_6] : memref<32x32xbf16, #tpu.memory_space<vmem>>, vector<32x32xbf16>
    %cst_7 = arith.constant dense<0.000000e+00> : vector<2x32xf32>
    %9 = tpu.matmul %7, %8, %cst_7 {dimension_numbers = #tpu.dot_dimension_numbers<[1], [0], [0], [1], [0, 0, 1, 1], [], []>} : vector<2x32xbf16>, vector<32x32xbf16>, vector<2x32xf32> -> vector<2x32xf32>
    %c0_8 = arith.constant 0 : index
    %c0_9 = arith.constant 0 : index
    %10 = vector.load %arg5[%c0_8, %c0_9] : memref<1x32xf32, #tpu.memory_space<vmem>>, vector<1x32xf32>
    %11 = vector.broadcast %10 : vector<1x32xf32> to vector<2x32xf32>
    %12 = arith.addf %9, %11 : vector<2x32xf32>
    %13 = arith.truncf %12 : vector<2x32xf32> to vector<2x32xbf16>
    %c0_10 = arith.constant 0 : index
    %c0_11 = arith.constant 0 : index
    %14 = vector.load %arg6[%c0_10, %c0_11] : memref<32x128xbf16, #tpu.memory_space<vmem>>, vector<32x128xbf16>
    %cst_12 = arith.constant dense<0.000000e+00> : vector<2x128xf32>
    %15 = tpu.matmul %13, %14, %cst_12 {dimension_numbers = #tpu.dot_dimension_numbers<[1], [0], [0], [1], [0, 0, 1, 1], [], []>} : vector<2x32xbf16>, vector<32x128xbf16>, vector<2x128xf32> -> vector<2x128xf32>
    %c0_13 = arith.constant 0 : index
    %c0_14 = arith.constant 0 : index
    %16 = vector.load %arg7[%c0_13, %c0_14] : memref<1x128xf32, #tpu.memory_space<vmem>>, vector<1x128xf32>
    %17 = vector.broadcast %16 : vector<1x128xf32> to vector<2x128xf32>
    %18 = arith.addf %15, %17 : vector<2x128xf32>
    %c0_15 = arith.constant 0 : index
    %c0_16 = arith.constant 0 : index
    %19 = vector.load %arg8[%c0_15, %c0_16] : memref<2x128xf32, #tpu.memory_space<vmem>>, vector<2x128xf32>
    tpu.vector_store %arg8[%c0_15, %c0_16], %18 {strides = array<i32>} : memref<2x128xf32, #tpu.memory_space<vmem>>, vector<2x128xf32>,
    return
  }
  func.func @transform_0(%arg0: i32) -> (i32, i32) {
    %c0_i32 = arith.constant 0 : i32
    %c0_i32_0 = arith.constant 0 : i32
    return %arg0, %c0_i32 : i32, i32
  }
  func.func @transform_1(%arg0: i32) -> (i32, i32) {
    %c0_i32 = arith.constant 0 : i32
    %c0_i32_0 = arith.constant 0 : i32
    %c0_i32_1 = arith.constant 0 : i32
    return %c0_i32, %c0_i32_0 : i32, i32
  }
  func.func @transform_2(%arg0: i32) -> (i32, i32) {
    %c0_i32 = arith.constant 0 : i32
    %c0_i32_0 = arith.constant 0 : i32
    %c0_i32_1 = arith.constant 0 : i32
    return %c0_i32, %c0_i32_0 : i32, i32
  }
  func.func @transform_3(%arg0: i32) -> (i32, i32) {
    %c0_i32 = arith.constant 0 : i32
    %c0_i32_0 = arith.constant 0 : i32
    %c0_i32_1 = arith.constant 0 : i32
    return %c0_i32, %c0_i32_0 : i32, i32
  }
  func.func @transform_4(%arg0: i32) -> (i32, i32) {
    %c0_i32 = arith.constant 0 : i32
    %c0_i32_0 = arith.constant 0 : i32
    %c0_i32_1 = arith.constant 0 : i32
    return %c0_i32, %c0_i32_0 : i32, i32
  }
  func.func @transform_5(%arg0: i32) -> (i32, i32) {
    %c0_i32 = arith.constant 0 : i32
    %c0_i32_0 = arith.constant 0 : i32
    %c0_i32_1 = arith.constant 0 : i32
    return %c0_i32, %c0_i32_0 : i32, i32
  }
  func.func @transform_6(%arg0: i32) -> (i32, i32) {
    %c0_i32 = arith.constant 0 : i32
    %c0_i32_0 = arith.constant 0 : i32
    %c0_i32_1 = arith.constant 0 : i32
    return %c0_i32, %c0_i32_0 : i32, i32
  }
  func.func @transform_7(%arg0: i32) -> (i32, i32) {
    %c0_i32 = arith.constant 0 : i32
    %c0_i32_0 = arith.constant 0 : i32
    return %arg0, %c0_i32 : i32, i32
  }
}

</mosaic_0001>

<bundles_post_ra>
// kernel: bert_class_forward.13
= control target key start
LH: loop header
LB: loop body
LE: loop exit
PB: predicated region body
PF: predicated region fallthrough
CT: control target
= control target key end

     0   :  { %vm19_vm0 = vcmask 785408   ;;  %v151_v0 = vmov 0.0   ;;  %vm152_vm1 = vmmov 0   ;;  %vm47_vm2 = vcmask 261120   ;;  %s195_s1 = inlined_call_operand.vmem [shape: bf16[32,96], index: 1, kind: input, shape index: {}]   ;;  %s196_s0 = inlined_call_operand.vmem [shape: bf16[16,32], index: 0, kind: input, shape index: {}]   ;;  %s197_s2 = inlined_call_operand.vmem [shape: f32[1,96], index: 2, kind: input, shape index: {}]   ;;  %s198_s3 = inlined_call_operand.vmem [shape: bf16[16,96], index: 3, kind: output, shape index: {}]  }
   0x1   :  { %138 = vmatprep.subr.bf16.mxu0 %v151_v0  ;;  %v148_v1 = vld [vmem:[%s195_s1] sm:$0xff]   ;;  %142 = vmatprep.mubr.msk.bf16.mxu0 %vm152_vm1, %v151_v0  ;;  %20 = vst.msk [vmem:[#allocation2] sm:$0xff] %vm19_vm0, %v151_v0  ;;  %21 = vst.msk [vmem:[#allocation2 + $0x8] sm:$0xff] %vm19_vm0, %v151_v0  ;;  %v149_v2 = vld [vmem:[%s195_s1 + $0x8] sm:$0xff]   ;;  %vm119_vm3 = vcmask 781312  }
   0x2   :  { %139 = vmatpush3.bf16.msra.mxu0 %v148_v1  ;;  %v150_v3 = vld [vmem:[%s196_s0] sm:$0xff]  }
   0x3   :  { %140 = vmatprep.subr.bf16.mxu0 %v151_v0  ;;  %v130_v12 = vld [vmem:[%s197_s2] ss:$0 sm:$0xff] }
   0x6   :  { %141 = vmatpush3.bf16.msra.mxu0 %v149_v2 }
   0x8   :  { %v22_v4 = vld [vmem:[#allocation2] sm:$0xff]  ;;  %v23_v6 = vld [vmem:[#allocation2 + $0x8] sm:$0xff] }
   0x9   :  { %143 = vmatmul.mubr.msk.bf16.vlgmr.msra.gmra.mrb[0].mxu0 %vm47_vm2, %v150_v3 }
  0xdc   :  { %v85_v5 = vpop.f32.mrb[0].mxu0 }
  0xdd   :  { %v92_v7 = vadd.f32 %v85_v5, %v22_v4  ;;  %v144_v8 = vpop.f32.mrb[1].mxu0 }
  0xde   :  { %v88_v9 = vpop.f32.mrb[2].mxu0 }
  0xdf   :  { %95 = vst.msk [vmem:[#allocation2] sm:$0xff] %vm19_vm0, %v92_v7  ;;  %v93_v10 = vadd.f32 %v88_v9, %v23_v6  ;;  %v145_v11 = vpop.f32.mrb[3].mxu0 }
  0xe1   :  { %96 = vst.msk [vmem:[#allocation2 + $0x8] sm:$0xff] %vm19_vm0, %v93_v10 }
  0xe6   :  { %v100_v13 = vld [vmem:[#allocation2] sm:$0xff] }
  0xe7   :  { %v109_v14 = vadd.f32 %v130_v12, %v100_v13 }
  0xe8   :  { %v101_v15 = vld [vmem:[#allocation2 + $0x8] sm:$0xff] }
  0xe9   :  { %v133_v16 = vpack.c.bf16 %v109_v14, %v109_v14  ;;  %v110_v17 = vadd.f32 %v130_v12, %v101_v15 }
  0xeb   :  { %120 = vst.msk [vmem:[%s198_s3] sm:$0xf] %vm119_vm3, %v133_v16  ;;  %v134_v18 = vpack.c.bf16 %v110_v17, %v110_v17 }
  0xed   :  { %121 = vst.msk [vmem:[%s198_s3 + $0x4] sm:$0xf] %vm119_vm3, %v134_v18 }

// kernel: bert_class_forward.15
= control target key start
LH: loop header
LB: loop body
LE: loop exit
PB: predicated region body
PF: predicated region fallthrough
CT: control target
= control target key end

     0   :  { %vm28_vm0 = vcmask 261120   ;;  %v220_v0 = vmov 0.0   ;;  %vm221_vm1 = vmmov 0   ;;  %vm178_vm2 = vcmask 257024   ;;  %s293_s1 = inlined_call_operand.vmem [shape: bf16[32,32], index: 1, kind: input, shape index: {}]   ;;  %s294_s0 = inlined_call_operand.vmem [shape: bf16[16,32], index: 0, kind: input, shape index: {}]   ;;  %s295_s3 = inlined_call_operand.vmem [shape: bf16[16,32], index: 3, kind: input, shape index: {}]   ;;  %s296_s2 = inlined_call_operand.vmem [shape: f32[1,32], index: 2, kind: input, shape index: {}]   ;;  %s297_s4 = inlined_call_operand.vmem [shape: f32[1,32], index: 4, kind: input, shape index: {}]   ;;  %s298_s5 = inlined_call_operand.vmem [shape: f32[1,32], index: 5, kind: input, shape index: {}]   ;;  %s299_s6 = inlined_call_operand.vmem [shape: bf16[16,32], index: 6, kind: output, shape index: {}]  }
   0x1   :  { %203 = vmatprep.subr.bf16.mxu0 %v220_v0  ;;  %v213_v1 = vld [vmem:[%s293_s1] sm:$0xff]   ;;  %207 = vmatprep.mubr.msk.bf16.mxu0 %vm221_vm1, %v220_v0  ;;  %29 = vst.msk [vmem:[#allocation2] sm:$0xff] %vm28_vm0, %v220_v0  ;;  %30 = vst.msk [vmem:[#allocation2 + $0x8] sm:$0xff] %vm28_vm0, %v220_v0  ;;  %v214_v2 = vld [vmem:[%s293_s1 + $0x8] sm:$0xff]  }
   0x2   :  { %204 = vmatpush3.bf16.msra.mxu0 %v213_v1  ;;  %v215_v3 = vld [vmem:[%s294_s0] sm:$0xff]  }
   0x3   :  { %205 = vmatprep.subr.bf16.mxu0 %v220_v0  ;;  %v197_v12 = vld [vmem:[%s295_s3] sm:$0xff]  }
   0x4   :  { %v189_v13 = vld [vmem:[%s296_s2] ss:$0 sm:$0xff]  ;;  %v198_v14 = vunpack.c.l.bf16 %v197_v12  ;;  %v199_v17 = vunpack.c.h.bf16 %v197_v12 }
   0x5   :  { %v190_v41 = vld [vmem:[%s297_s4] ss:$0 sm:$0xff] }
   0x6   :  { %206 = vmatpush3.bf16.msra.mxu0 %v214_v2  ;;  %v191_v43 = vld [vmem:[%s298_s5] ss:$0 sm:$0xff] }
   0x8   :  { %v31_v4 = vld [vmem:[#allocation2] sm:$0xff]  ;;  %v32_v6 = vld [vmem:[#allocation2 + $0x8] sm:$0xff] }
   0x9   :  { %208 = vmatmul.mubr.msk.bf16.vlgmr.msra.gmra.mrb[0].mxu0 %vm28_vm0, %v215_v3 }
  0xdc   :  { %v94_v5 = vpop.f32.mrb[0].mxu0 }
  0xdd   :  { %v101_v7 = vadd.f32 %v94_v5, %v31_v4  ;;  %v209_v8 = vpop.f32.mrb[1].mxu0 }
  0xde   :  { %v97_v9 = vpop.f32.mrb[2].mxu0 }
  0xdf   :  { %103 = vst.msk [vmem:[#allocation2] sm:$0xff] %vm28_vm0, %v101_v7  ;;  %v102_v10 = vadd.f32 %v97_v9, %v32_v6  ;;  %v210_v11 = vpop.f32.mrb[3].mxu0 }
  0xe1   :  { %104 = vst.msk [vmem:[#allocation2 + $0x8] sm:$0xff] %vm28_vm0, %v102_v10 }
  0xe6   :  { %v108_v15 = vld [vmem:[#allocation2] sm:$0xff] }
  0xe7   :  { %v117_v16 = vadd.f32 %v189_v13, %v108_v15 }
  0xe8   :  { %v109_v18 = vld [vmem:[#allocation2 + $0x8] sm:$0xff] }
  0xe9   :  { %v123_v19 = vadd.f32 %v198_v14, %v117_v16  ;;  %v118_v20 = vadd.f32 %v189_v13, %v109_v18 }
  0xeb   :  { %v125_v21 = vsel %vm28_vm0, %v123_v19, 0.0  ;;  %v124_v22 = vadd.f32 %v199_v17, %v118_v20 }
  0xec   :  { %126 = vadd.xlane.f32.xlu0 %v125_v21 }
  0xed   :  { %v128_v23 = vsel %vm28_vm0, %v124_v22, 0.0 }
  0xf0   :  { %129 = vadd.xlane.f32.xlu0 %v128_v23 }
 0x179   :  { %v127_v24 = vpop.xlane.xlu0 %126 }
 0x17a   :  { %v132_v25 = vmul.f32 0.03125, %v127_v24 }
 0x17c   :  { %v134_v26 = vsub.f32 %v123_v19, %v132_v25 }
 0x17d   :  { %v130_v27 = vpop.xlane.xlu0 %129 }
 0x17e   :  { %v133_v28 = vmul.f32 0.03125, %v130_v27  ;;  %v136_v29 = vmul.f32 %v134_v26, %v134_v26 }
 0x180   :  { %v135_v30 = vsub.f32 %v124_v22, %v133_v28  ;;  %v138_v31 = vsel %vm28_vm0, %v136_v29, 0.0 }
 0x181   :  { %139 = vadd.xlane.f32.xlu1 %v138_v31 }
 0x182   :  { %v137_v32 = vmul.f32 %v135_v30, %v135_v30 }
 0x184   :  { %v141_v33 = vsel %vm28_vm0, %v137_v32, 0.0 }
 0x185   :  { %142 = vadd.xlane.f32.xlu1 %v141_v33 }
 0x20e   :  { %v140_v34 = vpop.xlane.xlu1 %139 }
 0x20f   :  { %v144_v35 = vmul.f32 0.03125, %v140_v34 }
 0x211   :  { %v146_v36 = vadd.f32 1e-12, %v144_v35 }
 0x212   :  { %v143_v37 = vpop.xlane.xlu1 %142 }
 0x213   :  { %216 = vrsqrt.f32 %v146_v36  ;;  %v145_v38 = vmul.f32 0.03125, %v143_v37 }
 0x215   :  { %v147_v39 = vadd.f32 1e-12, %v145_v38 }
 0x217   :  { %218 = vrsqrt.f32 %v147_v39 }
 0x21d   :  { %v217_v40 = vpop.eup %216 }
 0x21e   :  { %v150_v42 = vmul.f32 %v217_v40, %v134_v26 }
 0x220   :  { %v159_v44 = vmul.f32 %v190_v41, %v150_v42 }
 0x221   :  { %v219_v45 = vpop.eup %218 }
 0x222   :  { %v168_v46 = vadd.f32 %v191_v43, %v159_v44  ;;  %v151_v47 = vmul.f32 %v219_v45, %v135_v30 }
 0x224   :  { %v194_v48 = vpack.c.bf16 %v168_v46, %v168_v46  ;;  %v160_v49 = vmul.f32 %v190_v41, %v151_v47 }
 0x226   :  { %179 = vst.msk [vmem:[%s299_s6] sm:$0xf] %vm178_vm2, %v194_v48  ;;  %v169_v50 = vadd.f32 %v191_v43, %v160_v49 }
 0x228   :  { %v195_v51 = vpack.c.bf16 %v169_v50, %v169_v50 }
 0x22a   :  { %180 = vst.msk [vmem:[%s299_s6 + $0x4] sm:$0xf] %vm178_vm2, %v195_v51 }

// kernel: bert_class_forward.12
= control target key start
LH: loop header
LB: loop body
LE: loop exit
PB: predicated region body
PF: predicated region fallthrough
CT: control target
= control target key end

     0   :  { %vm16_vm0 = vcmask 261120   ;;  %vm70_vm1 = vcmask 257024   ;;  %s129_s0 = inlined_call_operand.vmem [shape: f32[16,32], index: 0, kind: input, shape index: {}]   ;;  %s130_s1 = inlined_call_operand.vmem [shape: f32[1,32], index: 1, kind: input, shape index: {}]   ;;  %s131_s2 = inlined_call_operand.vmem [shape: f32[1,32], index: 2, kind: input, shape index: {}]   ;;  %s132_s3 = inlined_call_operand.vmem [shape: bf16[16,32], index: 3, kind: output, shape index: {}]  }
   0x1   :  { %v14_v0 = vld [vmem:[%s129_s0] sm:$0xff]  ;;  %v15_v1 = vld [vmem:[%s129_s0 + $0x8] sm:$0xff] }
   0x2   :  { %v17_v2 = vsel %vm16_vm0, %v14_v0, 0.0  ;;  %v20_v3 = vsel %vm16_vm0, %v15_v1, 0.0  ;;  %v77_v21 = vld [vmem:[%s130_s1] ss:$0 sm:$0xff] }
   0x3   :  { %18 = vadd.xlane.f32.xlu0 %v17_v2  ;;  %v78_v23 = vld [vmem:[%s131_s2] ss:$0 sm:$0xff] }
   0x7   :  { %21 = vadd.xlane.f32.xlu0 %v20_v3 }
  0x90   :  { %v19_v4 = vpop.xlane.xlu0 %18 }
  0x91   :  { %v24_v5 = vmul.f32 0.03125, %v19_v4 }
  0x93   :  { %v26_v6 = vsub.f32 %v14_v0, %v24_v5 }
  0x94   :  { %v22_v7 = vpop.xlane.xlu0 %21 }
  0x95   :  { %v25_v8 = vmul.f32 0.03125, %v22_v7  ;;  %v28_v9 = vmul.f32 %v26_v6, %v26_v6 }
  0x97   :  { %v27_v10 = vsub.f32 %v15_v1, %v25_v8  ;;  %v30_v11 = vsel %vm16_vm0, %v28_v9, 0.0 }
  0x98   :  { %31 = vadd.xlane.f32.xlu1 %v30_v11 }
  0x99   :  { %v29_v12 = vmul.f32 %v27_v10, %v27_v10 }
  0x9b   :  { %v33_v13 = vsel %vm16_vm0, %v29_v12, 0.0 }
  0x9c   :  { %34 = vadd.xlane.f32.xlu1 %v33_v13 }
 0x125   :  { %v32_v14 = vpop.xlane.xlu1 %31 }
 0x126   :  { %v36_v15 = vmul.f32 0.03125, %v32_v14 }
 0x128   :  { %v38_v16 = vadd.f32 1e-12, %v36_v15 }
 0x129   :  { %v35_v17 = vpop.xlane.xlu1 %34 }
 0x12a   :  { %83 = vrsqrt.f32 %v38_v16  ;;  %v37_v18 = vmul.f32 0.03125, %v35_v17 }
 0x12c   :  { %v39_v19 = vadd.f32 1e-12, %v37_v18 }
 0x12e   :  { %85 = vrsqrt.f32 %v39_v19 }
 0x134   :  { %v84_v20 = vpop.eup %83 }
 0x135   :  { %v42_v22 = vmul.f32 %v84_v20, %v26_v6 }
 0x137   :  { %v51_v24 = vmul.f32 %v77_v21, %v42_v22 }
 0x138   :  { %v86_v25 = vpop.eup %85 }
 0x139   :  { %v60_v26 = vadd.f32 %v78_v23, %v51_v24  ;;  %v43_v27 = vmul.f32 %v86_v25, %v27_v10 }
 0x13b   :  { %v81_v28 = vpack.c.bf16 %v60_v26, %v60_v26  ;;  %v52_v29 = vmul.f32 %v77_v21, %v43_v27 }
 0x13d   :  { %71 = vst.msk [vmem:[%s132_s3] sm:$0xf] %vm70_vm1, %v81_v28  ;;  %v61_v30 = vadd.f32 %v78_v23, %v52_v29 }
 0x13f   :  { %v82_v31 = vpack.c.bf16 %v61_v30, %v61_v30 }
 0x141   :  { %72 = vst.msk [vmem:[%s132_s3 + $0x4] sm:$0xf] %vm70_vm1, %v82_v31 }

// kernel: bert_class_forward.14
= control target key start
LH: loop header
LB: loop body
LE: loop exit
PB: predicated region body
PF: predicated region fallthrough
CT: control target
= control target key end

     0   :  { %s1002_s12 = smov 0   ;;  %s1004_s13 = smov 0   ;;  %s1114_s0 = inlined_call_operand.vmem [shape: bf16[2,8,96], index: 0, kind: input, shape index: {}, may-alias: {0,1}]   ;;  %s1115_s1 = inlined_call_operand.vmem [shape: bf16[2,8,96], index: 1, kind: input, shape index: {}, may-alias: {0,1}]   ;;  %s1116_s2 = inlined_call_operand.vmem [shape: f32[2,1,8], index: 2, kind: input, shape index: {}]   ;;  %s1117_s3 = inlined_call_operand.vmem [shape: bf16[2,8,32], index: 3, kind: output, shape index: {}]  }
   0x1   :  { %s1006_s14 = smov 0  }
   0x2 LB: > { %s25_s15 = sadd.s32 1, %s960_s13  ;;  %p803_p0 = scmp.ge.s32.totalorder %s964_s14, 1  ;;  %s964_s14 = sphi %s1006_s14, %s13_s14   ;;  %s960_s13 = sphi %s1004_s13, %s1119_s13   ;;  %s956_s12 = sphi %s1002_s12, %s1118_s12  }
   0x3   : > { %p27_p1 = scmp.ge.s32.totalorder %s25_s15, 2  ;;  %p172_p2 = scmp.lt.s32.totalorder %s964_s14, 3 }
   0x5   : > { %s1121_s15 = smov (%p27_p1, %s25_s15), 0  ;;  %p173_p3 = pnand %p803_p0, %p172_p2 }
   0x6   : > { %p207_p4 = scmp.lt.s32.totalorder (!%p173_p3), %s956_s12, 1  ;;  %v966_v0 = vmov (!%p173_p3), 0.0   ;;  %vm967_vm0 = vmmov (!%p173_p3), 0   ;;  %s968_s20 = smov (!%p173_p3), 96   ;;  %vm243_vm1 = vcmask (!%p173_p3), 64512   ;;  %vm307_vm2 = vcmask (!%p173_p3), 1043456  }
   0x7   : > { %176 = sbr.rel (%p173_p3) target bundleno = 1601 (0x641), region = 32  ;;  %836 = vmatprep.subr.bf16.mxu0 (!%p173_p3), %v966_v0  ;;  %838 = vmatprep.mubr.msk.bf16.mxu0 (!%p173_p3), %vm967_vm0, %v966_v0  ;;  %s969_s24 = smov (!%p173_p3), 64   ;;  %vm697_vm3 = vcmask (!%p173_p3), 130048   ;;  %vm699_vm4 = vcmask (!%p173_p3), 195584   ;;  %vm702_vm5 = vcmask (!%p173_p3), 257024  }
   0x8   : > { %842 = vmatprep.subr.bf16.mxu1 (!%p173_p3), %v966_v0  ;;  %844 = vmatprep.mubr.msk.bf16.mxu1 (!%p173_p3), %vm967_vm0, %v966_v0  ;;  %s970_s25 = smov (!%p173_p3), 88   ;;  %s971_s29 = smov (!%p173_p3), 72  }
   0x9   : > { %s972_s30 = smov (!%p173_p3), 120   ;;  %s973_s4 = smov (!%p173_p3), 80  }
   0xa   : > { %s974_s5 = smov (!%p173_p3), 112   ;;  %s975_s6 = smov (!%p173_p3), 104  }
   0xb   : > { %s976_s7 = smov (!%p173_p3), 56   ;;  %s977_s8 = smov (!%p173_p3), 48  }
   0xc   : > { %s978_s9 = smov (!%p173_p3), 40   ;;  %s979_s10 = smov (!%p173_p3), 8  }
   0xd   : > { %s980_s11 = smov (!%p173_p3), 16  }
   0xe   : > { %s1123_s12 = smov (!%p207_p4, %s956_s12), 1 }
   0xf   : > { %s1026_s16 = sshll.u32 %s1123_s12, 2  ;;  %s220_s28 = scalar_lea.vmem %s1116_s2, %s1123_s12 }
  0x10   : > { %s217_s19 = scalar_lea.vmem %s1115_s1, %s1026_s16  ;;  %s213_s23 = scalar_lea.vmem %s1114_s0, %s1026_s16  ;;  %v1049_v5 = vld [vmem:[%s220_s28] ss:$0 sm:$0xff] }
  0x11   : > { %v1032_v1 = vld [vmem:[%s217_s19] ss:$0 sps:$4 sm:$0xff]   ;;  %s981_s12 = smov 24   ;;  %s227_s19 = scalar_lea.vmem %s1117_s3, %s1026_s16 }
  0x12   : > { %241 = vrot.lane.b32.xlu0 %v1032_v1, %s968_s20  ;;  %v229_v4 = vld [vmem:[%s213_s23] sm:$0xf]  ;;  %302 = vrot.lane.b32.xlu1 %v1032_v1, %s969_s24 }
  0x13   : > { %v811_v19 = vcombine.low %v229_v4, %v229_v4 }
  0x16   : > { %356 = vrot.lane.b32.xlu1 %v1032_v1, %s970_s25 }
  0x84   : > { %v242_v2 = vpop.permute.xlu0 %241  ;;  %v303_v12 = vpop.permute.xlu1 %302 }
  0x85   : > { %v248_v3 = vsel %vm243_vm1, %v242_v2, 0  ;;  %v309_v13 = vsel %vm307_vm2, %v303_v12, 0 }
  0x86   : > { %837 = vmatpush3.bf16.xpose.msra.mxu0 %v248_v3  ;;  %843 = vmatpush3.bf16.msra.mxu1 %v309_v13 }
  0x87   : > { %854 = vmatprep.subr.bf16.mxu0 %v966_v0  ;;  %848 = vmatprep.subr.bf16.mxu1 %v966_v0 }
  0x88   : > { %v357_v20 = vpop.permute.xlu1 %356 }
  0x89   : > { %v362_v26 = vsel %vm243_vm1, %v357_v20, 0 }
  0x8d   : > { %839 = vmatmul.mubr.msk.bf16.vlgmr.msra.gmra.mrb[0].mxu0 %vm243_vm1, %v229_v4 }
  0x8e   : > { %856 = vmatprep.mubr.msk.bf16.mxu0 %vm967_vm0, %v966_v0 }
 0x160   : > { %v284_v6 = vpop.f32.mrb[0].mxu0 }
 0x161   : > { %v285_v7 = vadd.f32 %v1049_v5, %v284_v6  ;;  %v840_v8 = vpop.f32.mrb[1].mxu0 }
 0x162   : > { %v287_v9 = vpop.f32.mrb[2].mxu0 }
 0x163   : > { %v841_v10 = vpop.f32.mrb[3].mxu0  ;;  %v290_v11 = vsel %vm243_vm1, %v285_v7, -inf }
 0x164   : > { %291 = vmax.xlane.f32.xlu0 %v290_v11 }
 0x17a   : > { %576 = vrot.lane.b32.xlu0 %v1032_v1, %s971_s29 }
 0x1f1   : > { %v292_v14 = vpop.xlane.xlu0 %291 }
 0x1f2   : > { %v293_v15 = vsub.f32 %v285_v7, %v292_v14 }
 0x1f4   : > { %v294_v16 = vmul.f32 1.442695, %v293_v15 }
 0x1f5   : > { %v577_v29 = vpop.permute.xlu0 %576 }
 0x1f6   : > { %926 = vpow2.f32 %v294_v16  ;;  %v582_v31 = vsel %vm243_vm1, %v577_v29, 0 }
 0x200   : > { %v927_v17 = vpop.eup %926 }
 0x201   : > { %v296_v18 = vsel %vm243_vm1, %v927_v17, 0.0 }
 0x202   : > { %297 = vadd.xlane.f32.xlu1 %v296_v18 }
 0x213   : > { %354 = vrot.lane.b32.xlu1 %v811_v19, %s972_s30 }
 0x217   : > { %466 = vrot.lane.b32.xlu1 %v1032_v1, %s973_s4 }
 0x21b   : > { %464 = vrot.lane.b32.xlu1 %v811_v19, %s974_s5 }
 0x21f   : > { %574 = vrot.lane.b32.xlu1 %v811_v19, %s975_s6 }
 0x28f   : > { %v298_v21 = vpop.xlane.xlu1 %297 }
 0x290   : > { %928 = vrcp.f32 %v298_v21 }
 0x293   : > { %v355_v24 = vpop.permute.xlu1 %354 }
 0x297   : > { %v467_v27 = vpop.permute.xlu1 %466 }
 0x298   : > { %v472_v28 = vsel %vm243_vm1, %v467_v27, 0 }
 0x29a   : > { %v929_v22 = vpop.eup %928 }
 0x29b   : > { %v300_v23 = vmul.f32 %v929_v22, %v927_v17  ;;  %v465_v30 = vpop.permute.xlu1 %464 }
 0x29d   : > { %v301_v25 = vpack.c.bf16 %v300_v23, %v300_v23 }
 0x29f   : > { %845 = vmatmul.mubr.msk.bf16.vlgmr.msra.gmra.mrb[0].mxu1 %vm243_vm1, %v301_v25  ;;  %v575_v32 = vpop.permute.xlu1 %574 }
 0x2a0   : > { %849 = vmatpush3.bf16.xpose.msra.mxu1 %v362_v26  ;;  %850 = vmatprep.mubr.msk.bf16.mxu1 %vm967_vm0, %v966_v0 }
 0x2a1   : > { %860 = vmatprep.subr.bf16.mxu1 %v966_v0 }
 0x2a7   : > { %851 = vmatmul.mubr.msk.bf16.vlgmr.msra.gmra.mrb[4].mxu1 %vm243_vm1, %v355_v24 }
 0x2a8   : > { %861 = vmatpush3.bf16.xpose.msra.mxu1 %v472_v28  ;;  %862 = vmatprep.mubr.msk.bf16.mxu1 %vm967_vm0, %v966_v0 }
 0x2a9   : > { %872 = vmatprep.subr.bf16.mxu1 %v966_v0 }
 0x2af   : > { %863 = vmatmul.mubr.msk.bf16.vlgmr.msra.gmra.mrb[8].mxu1 %vm243_vm1, %v465_v30 }
 0x2b0   : > { %873 = vmatpush3.bf16.xpose.msra.mxu1 %v582_v31  ;;  %874 = vmatprep.mubr.msk.bf16.mxu1 %vm967_vm0, %v966_v0 }
 0x2b7   : > { %875 = vmatmul.mubr.msk.bf16.vlgmr.msra.gmra.mrb[12].mxu1 %vm243_vm1, %v575_v32 }
 0x372   : > { %v1073_v33 = vpop.f32.mrb[0].mxu1 }
 0x373   : > { %v846_v34 = vpop.f32.mrb[1].mxu1 }
 0x374   : > { %v348_v35 = vpop.f32.mrb[2].mxu1 }
 0x375   : > { %v847_v36 = vpop.f32.mrb[3].mxu1 }
 0x37a   : > { %v398_v37 = vpop.f32.mrb[4].mxu1 }
 0x37b   : > { %v399_v38 = vadd.f32 %v1049_v5, %v398_v37  ;;  %v852_v39 = vpop.f32.mrb[5].mxu1 }
 0x37c   : > { %v401_v40 = vpop.f32.mrb[6].mxu1 }
 0x37d   : > { %v853_v41 = vpop.f32.mrb[7].mxu1  ;;  %v404_v42 = vsel %vm243_vm1, %v399_v38, -inf }
 0x37e   : > { %405 = vmax.xlane.f32.xlu1 %v404_v42 }
 0x382   : > { %v508_v43 = vpop.f32.mrb[8].mxu1 }
 0x383   : > { %v509_v44 = vadd.f32 %v1049_v5, %v508_v43  ;;  %v864_v45 = vpop.f32.mrb[9].mxu1 }
 0x384   : > { %v511_v46 = vpop.f32.mrb[10].mxu1 }
 0x385   : > { %v514_v47 = vsel %vm243_vm1, %v509_v44, -inf  ;;  %v865_v48 = vpop.f32.mrb[11].mxu1 }
 0x386   : > { %515 = vmax.xlane.f32.xlu0 %v514_v47 }
 0x38a   : > { %v618_v49 = vpop.f32.mrb[12].mxu1 }
 0x38b   : > { %v619_v50 = vadd.f32 %v1049_v5, %v618_v49  ;;  %v876_v51 = vpop.f32.mrb[13].mxu1 }
 0x38c   : > { %v621_v52 = vpop.f32.mrb[14].mxu1 }
 0x38d   : > { %v624_v53 = vsel %vm243_vm1, %v619_v50, -inf  ;;  %v877_v54 = vpop.f32.mrb[15].mxu1 }
 0x38e   : > { %625 = vmax.xlane.f32.xlu1 %v624_v53 }
 0x40b   : > { %v406_v55 = vpop.xlane.xlu1 %405 }
 0x40c   : > { %v407_v56 = vsub.f32 %v399_v38, %v406_v55 }
 0x40e   : > { %v408_v57 = vmul.f32 1.442695, %v407_v56 }
 0x410   : > { %930 = vpow2.f32 %v408_v57 }
 0x413   : > { %v516_v3 = vpop.xlane.xlu0 %515 }
 0x414   : > { %v517_v4 = vsub.f32 %v509_v44, %v516_v3 }
 0x416   : > { %v518_v5 = vmul.f32 1.442695, %v517_v4 }
 0x41a   : > { %v931_v58 = vpop.eup %930 }
 0x41b   : > { %v626_v59 = vpop.xlane.xlu1 %625  ;;  %v410_v60 = vsel %vm243_vm1, %v931_v58, 0.0 }
 0x41c   : > { %v627_v61 = vsub.f32 %v619_v50, %v626_v59  ;;  %411 = vadd.xlane.f32.xlu1 %v410_v60 }
 0x41e   : > { %v628_v62 = vmul.f32 1.442695, %v627_v61 }
 0x420   : > { %932 = vpow2.f32 %v628_v62 }
 0x421   : > { %934 = vpow2.f32 %v518_v5 }
 0x42a   : > { %v933_v63 = vpop.eup %932 }
 0x42b   : > { %v630_v2 = vsel %vm243_vm1, %v933_v63, 0.0  ;;  %v935_v6 = vpop.eup %934 }
 0x42c   : > { %631 = vadd.xlane.f32.xlu0 %v630_v2  ;;  %v520_v7 = vsel %vm243_vm1, %v935_v6, 0.0 }
 0x42d   : > { %416 = vrot.lane.b32.xlu1 %v1032_v1, %s976_s7 }
 0x442   : > { %526 = vrot.lane.b32.xlu0 %v1032_v1, %s977_s8 }
 0x451   : > { %521 = vadd.xlane.f32.xlu1 %v520_v7 }
 0x462   : > { %636 = vrot.lane.b32.xlu1 %v1032_v1, %s978_s9 }
 0x4a9   : > { %v412_v8 = vpop.xlane.xlu1 %411 }
 0x4aa   : > { %936 = vrcp.f32 %v412_v8 }
 0x4ad   : > { %v417_v9 = vpop.permute.xlu1 %416 }
 0x4ae   : > { %v422_v10 = vsel %vm307_vm2, %v417_v9, 0 }
 0x4af   : > { %855 = vmatpush3.bf16.msra.mxu0 %v422_v10 }
 0x4b0   : > { %866 = vmatprep.subr.bf16.mxu0 %v966_v0 }
 0x4b4   : > { %v937_v11 = vpop.eup %936 }
 0x4b5   : > { %v414_v12 = vmul.f32 %v937_v11, %v931_v58 }
 0x4b7   : > { %v415_v13 = vpack.c.bf16 %v414_v12, %v414_v12 }
 0x4b9   : > { %857 = vmatmul.mubr.msk.bf16.vlgmr.msra.gmra.mrb[4].mxu0 %vm243_vm1, %v415_v13  ;;  %v632_v14 = vpop.xlane.xlu0 %631 }
 0x4ba   : > { %868 = vmatprep.mubr.msk.bf16.mxu0 %vm967_vm0, %v966_v0 }
 0x4bd   : > { %v527_v15 = vpop.permute.xlu0 %526 }
 0x4be   : > { %v532_v1 = vsel %vm307_vm2, %v527_v15, 0 }
 0x4bf   : > { %867 = vmatpush3.bf16.msra.mxu0 %v532_v1 }
 0x4c0   : > { %878 = vmatprep.subr.bf16.mxu0 %v966_v0 }
 0x4de   : > { %v522_v16 = vpop.xlane.xlu1 %521 }
 0x4df   : > { %938 = vrcp.f32 %v522_v16 }
 0x4e0   : > { %940 = vrcp.f32 %v632_v14 }
 0x4e2   : > { %v637_v18 = vpop.permute.xlu1 %636 }
 0x4e3   : > { %v642_v20 = vsel %vm307_vm2, %v637_v18, 0 }
 0x4e9   : > { %v939_v17 = vpop.eup %938 }
 0x4ea   : > { %v524_v19 = vmul.f32 %v939_v17, %v935_v6  ;;  %v941_v22 = vpop.eup %940 }
 0x4eb   : > { %v634_v23 = vmul.f32 %v941_v22, %v933_v63 }
 0x4ec   : > { %v525_v21 = vpack.c.bf16 %v524_v19, %v524_v19 }
 0x4ed   : > { %v635_v24 = vpack.c.bf16 %v634_v23, %v634_v23 }
 0x4ee   : > { %869 = vmatmul.mubr.msk.bf16.vlgmr.msra.gmra.mrb[8].mxu0 %vm243_vm1, %v525_v21 }
 0x4ef   : > { %879 = vmatpush3.bf16.msra.mxu0 %v642_v20  ;;  %880 = vmatprep.mubr.msk.bf16.mxu0 %vm967_vm0, %v966_v0 }
 0x4f6   : > { %881 = vmatmul.mubr.msk.bf16.vlgmr.msra.gmra.mrb[12].mxu0 %vm243_vm1, %v635_v24 }
 0x58c   : > { %v458_v25 = vpop.f32.mrb[4].mxu0 }
 0x58d   : > { %685 = vrot.lane.b32.xlu1 %v458_v25, %s979_s10  ;;  %v858_v26 = vpop.f32.mrb[5].mxu0 }
 0x58e   : > { %v461_v27 = vpop.f32.mrb[6].mxu0 }
 0x58f   : > { %v859_v28 = vpop.f32.mrb[7].mxu0 }
 0x5c1   : > { %v568_v29 = vpop.f32.mrb[8].mxu0 }
 0x5c2   : > { %689 = vrot.lane.b32.xlu0 %v568_v29, %s980_s11  ;;  %v870_v30 = vpop.f32.mrb[9].mxu0 }
 0x5c3   : > { %v571_v31 = vpop.f32.mrb[10].mxu0 }
 0x5c4   : > { %v871_v32 = vpop.f32.mrb[11].mxu0 }
 0x5c9   : > { %v678_v34 = vpop.f32.mrb[12].mxu0 }
 0x5ca   : > { %693 = vrot.lane.b32.xlu1 %v678_v34, %s981_s12  ;;  %v882_v0 = vpop.f32.mrb[13].mxu0 }
 0x5cb   : > { %v681_v35 = vpop.f32.mrb[14].mxu0 }
 0x5cc   : > { %v883_v36 = vpop.f32.mrb[15].mxu0 }
 0x5ff   : > { %v686_v37 = vpop.permute.xlu1 %685 }
 0x600   : > { %v696_v39 = vsel %vm243_vm1, %v1073_v33, %v686_v37 }
 0x634   : > { %v690_v38 = vpop.permute.xlu0 %689 }
 0x635   : > { %v698_v40 = vsel %vm697_vm3, %v696_v39, %v690_v38 }
 0x63c   : > { %v694_v41 = vpop.permute.xlu1 %693 }
 0x63d   : > { %v700_v42 = vsel %vm699_vm4, %v698_v40, %v694_v41 }
 0x63e   : > { %v701_v43 = vpack.c.bf16 %v700_v42, %v700_v42 }
 0x640   : > { %703 = vst.msk [vmem:[%s227_s19] sm:$0xf] %vm702_vm5, %v701_v43 }
 0x641 PF: > { %s13_s14 = sadd.s32 1, %s964_s14   ;;  %s1118_s12 = smov %s960_s13 }
 0x642   : > { %p10_p5 = scmp.ge.s32.totalorder %s13_s14, 4   ;;  %s1119_s13 = smov %s1121_s15 }
 0x644   :  { %12 = sbr.rel (!%p10_p5) target bundleno = 2 (0x2), region = 68 }

// kernel: bert_class_forward.16
= control target key start
LH: loop header
LB: loop body
LE: loop exit
PB: predicated region body
PF: predicated region fallthrough
CT: control target
= control target key end

     0   :  { %v175_v0 = vmov 0.0   ;;  %vm176_vm0 = vmmov 0   ;;  %vm46_vm1 = vcmask 261120   ;;  %s212_s1 = inlined_call_operand.vmem [shape: bf16[32,128], index: 1, kind: input, shape index: {}]   ;;  %s213_s0 = inlined_call_operand.vmem [shape: bf16[16,32], index: 0, kind: input, shape index: {}]   ;;  %s214_s2 = inlined_call_operand.vmem [shape: f32[1,128], index: 2, kind: input, shape index: {}]   ;;  %s215_s3 = inlined_call_operand.vmem [shape: bf16[16,128], index: 3, kind: output, shape index: {}]  }
   0x1   :  { %158 = vmatprep.subr.bf16.mxu0 %v175_v0  ;;  %v168_v1 = vld [vmem:[%s212_s1] sm:$0xff]   ;;  %162 = vmatprep.mubr.msk.bf16.mxu0 %vm176_vm0, %v175_v0  ;;  %v169_v2 = vld [vmem:[%s212_s1 + $0x8] sm:$0xff]  }
   0x2   :  { %159 = vmatpush3.bf16.msra.mxu0 %v168_v1  ;;  %v170_v3 = vld [vmem:[%s213_s0] sm:$0xff]  }
   0x3   :  { %160 = vmatprep.subr.bf16.mxu0 %v175_v0  ;;  %v145_v4 = vld [vmem:[%s214_s2] ss:$0 sm:$0xff] }
   0x6   :  { %161 = vmatpush3.bf16.msra.mxu0 %v169_v2 }
   0x9   :  { %163 = vmatmul.mubr.msk.bf16.vlgmr.msra.gmra.mrb[0].mxu0 %vm46_vm1, %v170_v3 }
  0xdc   :  { %v84_v5 = vpop.f32.mrb[0].mxu0 }
  0xdd   :  { %v107_v6 = vadd.f32 %v145_v4, %v84_v5  ;;  %v164_v7 = vpop.f32.mrb[1].mxu0 }
  0xde   :  { %v87_v8 = vpop.f32.mrb[2].mxu0 }
  0xdf   :  { %v111_v9 = vmul.f32 0.044715, %v107_v6  ;;  %v108_v10 = vadd.f32 %v145_v4, %v87_v8  ;;  %v165_v11 = vpop.f32.mrb[3].mxu0  ;;  %v109_v24 = vmul.f32 0.5, %v107_v6 }
  0xe1   :  { %v113_v12 = vmul.f32 %v111_v9, %v107_v6  ;;  %v112_v13 = vmul.f32 0.044715, %v108_v10  ;;  %v110_v25 = vmul.f32 0.5, %v108_v10 }
  0xe3   :  { %v115_v14 = vmul.f32 %v113_v12, %v107_v6  ;;  %v114_v15 = vmul.f32 %v112_v13, %v108_v10 }
  0xe5   :  { %v117_v16 = vadd.f32 %v115_v14, %v107_v6  ;;  %v116_v17 = vmul.f32 %v114_v15, %v108_v10 }
  0xe7   :  { %v119_v18 = vmul.f32 0.7978846, %v117_v16  ;;  %v118_v19 = vadd.f32 %v116_v17, %v108_v10 }
  0xe9   :  { %171 = vtanh.f32 %v119_v18  ;;  %v120_v20 = vmul.f32 0.7978846, %v118_v19 }
  0xeb   :  { %173 = vtanh.f32 %v120_v20 }
  0xf3   :  { %v172_v21 = vpop.eup %171 }
  0xf4   :  { %v123_v22 = vadd.f32 1.0, %v172_v21 }
  0xf5   :  { %v174_v23 = vpop.eup %173 }
  0xf6   :  { %v124_v26 = vadd.f32 1.0, %v174_v23  ;;  %v125_v27 = vmul.f32 %v123_v22, %v109_v24 }
  0xf8   :  { %v126_v28 = vmul.f32 %v124_v26, %v110_v25 }
  0xfa   :  { %v153_v29 = vpack.c.bf16 %v126_v28, %v125_v27 }
  0xfc   :  { %154 = vst [vmem:[%s215_s3] sm:$0xff] %v153_v29  }

// kernel: bert_class_forward.23
= control target key start
LH: loop header
LB: loop body
LE: loop exit
PB: predicated region body
PF: predicated region fallthrough
CT: control target
= control target key end

     0   :  { %v326_v1 = vmov 0.0   ;;  %vm327_vm0 = vmmov 0   ;;  %s414_s0 = inlined_call_operand.vmem [shape: bf16[2,32], index: 0, kind: input, shape index: {}]   ;;  %s415_s1 = inlined_call_operand.vmem [shape: bf16[32,32], index: 1, kind: input, shape index: {}]   ;;  %s416_s2 = inlined_call_operand.vmem [shape: f32[1,32], index: 2, kind: input, shape index: {}]   ;;  %s417_s3 = inlined_call_operand.vmem [shape: bf16[32,32], index: 3, kind: input, shape index: {}]   ;;  %s418_s4 = inlined_call_operand.vmem [shape: f32[1,32], index: 4, kind: input, shape index: {}]   ;;  %s419_s5 = inlined_call_operand.vmem [shape: bf16[32,128], index: 5, kind: input, shape index: {}]   ;;  %s420_s6 = inlined_call_operand.vmem [shape: f32[1,128], index: 6, kind: input, shape index: {}]   ;;  %s421_s7 = inlined_call_operand.hbm [shape: f32[2,128], index: 7, kind: output, shape index: {}]  }
   0x1   :  { %v294_v0 = vld [vmem:[%s415_s1] sm:$0xff]   ;;  %267 = vmatprep.subr.bf16.mxu0 %v326_v1  ;;  %275 = vmatprep.subr.bf16.mxu1 %v326_v1  ;;  %v295_v2 = vld [vmem:[%s415_s1 + $0x8] sm:$0xff]  }
   0x2   :  { %268 = vmatpush3.bf16.msra.mxu0 %v294_v0  ;;  %271 = vmatprep.mubr.msk.bf16.mxu0 %vm327_vm0, %v326_v1 }
   0x3   :  { %269 = vmatprep.subr.bf16.mxu0 %v326_v1  ;;  %279 = vmatprep.mubr.msk.bf16.mxu1 %vm327_vm0, %v326_v1 }
   0x4   :  { %12 = vsyncpa [#allocation3], 0  ;;  %v28_v3 = vld [vmem:[%s414_s0] sm:$0x1]  ;;  %vm52_vm1 = vcmask 261120   ;;  %v297_v5 = vld [vmem:[%s417_s3 + $0x8] sm:$0xff]  }
   0x5   :  { %v296_v4 = vld [vmem:[%s417_s3] sm:$0xff]   ;;  %v299_v15 = vld [vmem:[%s419_s5 + $0x8] sm:$0xff]   ;;  %s328_s17 = smov [#allocation2]  }
   0x6   :  { %270 = vmatpush3.bf16.msra.mxu0 %v295_v2  ;;  %276 = vmatpush3.bf16.msra.mxu1 %v296_v4  ;;  %v298_v6 = vld [vmem:[%s419_s5] sm:$0xff]   ;;  %s238_s18 = sshll.u32 %s328_s17, 4  ;;  %s239_s18 = int_to_ptr.vmem [resolvable:$true] %s238_s18 }
   0x7   :  { %283 = vmatprep.subr.bf16.mxu0 %v326_v1  ;;  %277 = vmatprep.subr.bf16.mxu1 %v326_v1  ;;  %v246_v7 = vld [vmem:[%s416_s2] ss:$0 sm:$0xff]  ;;  %p307_p1 = scmp.lt.s32.totalorder %s239_s18, %s239_s18 }
   0x8   :  { %v250_v16 = vld [vmem:[%s418_s4] ss:$0 sm:$0xff]  ;;  %s302_s4 = scalar_lea.vmem %s239_s18, 32 }
   0x9   :  { %272 = vmatmul.mubr.msk.bf16.vlgmr.msra.gmra.mrb[0].mxu0 %vm52_vm1, %v28_v3  ;;  %v254_v23 = vld [vmem:[%s420_s6] ss:$0 sm:$0xff]  ;;  %p303_p0 = scmp.ne.s32.totalorder %s239_s18, %s302_s4  ;;  %p308_p2 = scmp.lt.s32.totalorder %s302_s4, %s302_s4 }
   0xa   :  { %287 = vmatprep.mubr.msk.bf16.mxu0 %vm327_vm0, %v326_v1  ;;  %278 = vmatpush3.bf16.msra.mxu1 %v297_v5 }
   0xb   :  { %284 = vmatpush3.bf16.msra.mxu0 %v298_v6  ;;  %p309_p3 = por %p308_p2, %p307_p1 }
   0xc   :  { %285 = vmatprep.subr.bf16.mxu0 %v326_v1 }
   0xd   :  { %p310_p4 = pnand %p309_p3, %p303_p0 }
   0xf   :  { %286 = vmatpush3.bf16.msra.mxu0 %v299_v15 }
  0xdc   :  { %v90_v8 = vpop.f32.mrb[0].mxu0 }
  0xdd   :  { %v91_v9 = vadd.f32 %v246_v7, %v90_v8  ;;  %v273_v10 = vpop.f32.mrb[1].mxu0 }
  0xde   :  { %v93_v11 = vpop.f32.mrb[2].mxu0 }
  0xdf   :  { %300 = vtanh.f32 %v91_v9  ;;  %v274_v12 = vpop.f32.mrb[3].mxu0 }
  0xe9   :  { %v301_v13 = vpop.eup %300 }
  0xea   :  { %v97_v14 = vpack.c.bf16 %v301_v13, %v301_v13 }
  0xec   :  { %280 = vmatmul.mubr.msk.bf16.vlgmr.msra.gmra.mrb[0].mxu1 %vm52_vm1, %v97_v14 }
 0x1bf   :  { %v158_v17 = vpop.f32.mrb[0].mxu1 }
 0x1c0   :  { %v159_v18 = vadd.f32 %v250_v16, %v158_v17  ;;  %v281_v19 = vpop.f32.mrb[1].mxu1 }
 0x1c1   :  { %v161_v20 = vpop.f32.mrb[2].mxu1 }
 0x1c2   :  { %v164_v21 = vpack.c.bf16 %v159_v18, %v159_v18  ;;  %v282_v22 = vpop.f32.mrb[3].mxu1 }
 0x1c4   :  { %288 = vmatmul.mubr.msk.bf16.vlgmr.msra.gmra.mrb[4].mxu0 %vm52_vm1, %v164_v21 }
 0x297   :  { %v225_v24 = vpop.f32.mrb[4].mxu0 }
 0x298   :  { %v226_v25 = vadd.f32 %v254_v23, %v225_v24  ;;  %v289_v26 = vpop.f32.mrb[5].mxu0 }
 0x299   :  { %v228_v27 = vpop.f32.mrb[6].mxu0 }
 0x29a   :  { %231 = vst [vmem:[#allocation2] sm:$0x3] %v226_v25  ;;  %v290_v28 = vpop.f32.mrb[7].mxu0 }
 0x29b   :  { %313 = shalt.err (!%p310_p4)
}
 0x29c   :  { %s314_s6 = scalar_lea.hbm %s421_s7, 32 }
 0x29d   :  { %p315_p5 = scmp.ne.s32.totalorder %s421_s7, %s314_s6  ;;  %p318_p6 = scmp.lt.u32.totalorder %s314_s6, %s421_s7 }
 0x29f   :  { %p320_p7 = pnand %p318_p6, %p315_p5 }
 0x2a1   :  { %323 = shalt.err (!%p320_p7)
}
 0x2a2   :  { %241 = dma.vmem_to_hbm [thread:$0]  %s239_s18, 32, %s421_s7, [#allocation3]  }
 0x2a3   :  { %324 = dma.done.wait [#allocation3], 32  }
 0x2a4   :  { %325 = vsyncadd [#allocation3], 4294967264 }
 0x2a5   :  { %245 = vsyncpa [#allocation3], 1 }

// kernel: bert_class_forward.17
= control target key start
LH: loop header
LB: loop body
LE: loop exit
PB: predicated region body
PF: predicated region fallthrough
CT: control target
= control target key end

     0   :  { %vm28_vm0 = vcmask 261120   ;;  %v295_v0 = vmov 0.0   ;;  %vm296_vm1 = vmmov 0   ;;  %vm224_vm2 = vcmask 257024   ;;  %s385_s1 = inlined_call_operand.vmem [shape: bf16[128,32], index: 1, kind: input, shape index: {}]   ;;  %s386_s0 = inlined_call_operand.vmem [shape: bf16[16,128], index: 0, kind: input, shape index: {}]   ;;  %s387_s3 = inlined_call_operand.vmem [shape: bf16[16,32], index: 3, kind: input, shape index: {}]   ;;  %s388_s2 = inlined_call_operand.vmem [shape: f32[1,32], index: 2, kind: input, shape index: {}]   ;;  %s389_s4 = inlined_call_operand.vmem [shape: f32[1,32], index: 4, kind: input, shape index: {}]   ;;  %s390_s5 = inlined_call_operand.vmem [shape: f32[1,32], index: 5, kind: input, shape index: {}]   ;;  %s391_s6 = inlined_call_operand.vmem [shape: bf16[16,32], index: 6, kind: output, shape index: {}]  }
   0x1   :  { %260 = vmatprep.subr.bf16.mxu0 %v295_v0  ;;  %v282_v1 = vld [vmem:[%s385_s1] sm:$0xff]   ;;  %276 = vmatprep.mubr.msk.bf16.mxu0 %vm296_vm1, %v295_v0  ;;  %29 = vst.msk [vmem:[#allocation2] sm:$0xff] %vm28_vm0, %v295_v0  ;;  %30 = vst.msk [vmem:[#allocation2 + $0x8] sm:$0xff] %vm28_vm0, %v295_v0  ;;  %v283_v2 = vld [vmem:[%s385_s1 + $0x8] sm:$0xff]  }
   0x2   :  { %261 = vmatpush3.bf16.msra.mxu0 %v282_v1  ;;  %v284_v3 = vld [vmem:[%s385_s1 + $0x10] sm:$0xff]   ;;  %v285_v4 = vld [vmem:[%s385_s1 + $0x18] sm:$0xff]   ;;  %v286_v5 = vld [vmem:[%s385_s1 + $0x20] sm:$0xff]  }
   0x3   :  { %262 = vmatprep.subr.bf16.mxu0 %v295_v0  ;;  %v287_v6 = vld [vmem:[%s385_s1 + $0x28] sm:$0xff]   ;;  %v288_v7 = vld [vmem:[%s385_s1 + $0x30] sm:$0xff]   ;;  %v289_v8 = vld [vmem:[%s385_s1 + $0x38] sm:$0xff]  }
   0x4   :  { %v290_v9 = vld [vmem:[%s386_s0] sm:$0xff]  }
   0x5   :  { %v248_v18 = vld [vmem:[%s387_s3] sm:$0xff]  }
   0x6   :  { %263 = vmatpush3.bf16.msra.mxu0 %v283_v2  ;;  %v240_v19 = vld [vmem:[%s388_s2] ss:$0 sm:$0xff]  ;;  %v249_v20 = vunpack.c.l.bf16 %v248_v18  ;;  %v250_v23 = vunpack.c.h.bf16 %v248_v18 }
   0x7   :  { %264 = vmatprep.subr.bf16.mxu0 %v295_v0  ;;  %v241_v47 = vld [vmem:[%s389_s4] ss:$0 sm:$0xff] }
   0x8   :  { %v31_v10 = vld [vmem:[#allocation2] sm:$0xff]  ;;  %v32_v12 = vld [vmem:[#allocation2 + $0x8] sm:$0xff] }
   0x9   :  { %v242_v49 = vld [vmem:[%s390_s5] ss:$0 sm:$0xff] }
   0xa   :  { %265 = vmatpush3.bf16.msra.mxu0 %v284_v3 }
   0xb   :  { %266 = vmatprep.subr.bf16.mxu0 %v295_v0 }
   0xe   :  { %267 = vmatpush3.bf16.msra.mxu0 %v285_v4 }
   0xf   :  { %268 = vmatprep.subr.bf16.mxu0 %v295_v0 }
  0x12   :  { %269 = vmatpush3.bf16.msra.mxu0 %v286_v5 }
  0x13   :  { %270 = vmatprep.subr.bf16.mxu0 %v295_v0 }
  0x16   :  { %271 = vmatpush3.bf16.msra.mxu0 %v287_v6 }
  0x17   :  { %272 = vmatprep.subr.bf16.mxu0 %v295_v0 }
  0x1a   :  { %273 = vmatpush3.bf16.msra.mxu0 %v288_v7 }
  0x1b   :  { %274 = vmatprep.subr.bf16.mxu0 %v295_v0 }
  0x1e   :  { %275 = vmatpush3.bf16.msra.mxu0 %v289_v8 }
  0x21   :  { %277 = vmatmul.mubr.bf16.vlgmr.msra.gmra.mrb[0].mxu0 %v290_v9 }
  0xf4   :  { %v139_v11 = vpop.f32.mrb[0].mxu0 }
  0xf5   :  { %v146_v13 = vadd.f32 %v139_v11, %v31_v10  ;;  %v278_v14 = vpop.f32.mrb[1].mxu0 }
  0xf6   :  { %v142_v15 = vpop.f32.mrb[2].mxu0 }
  0xf7   :  { %149 = vst.msk [vmem:[#allocation2] sm:$0xff] %vm28_vm0, %v146_v13  ;;  %v147_v16 = vadd.f32 %v142_v15, %v32_v12  ;;  %v279_v17 = vpop.f32.mrb[3].mxu0 }
  0xf9   :  { %150 = vst.msk [vmem:[#allocation2 + $0x8] sm:$0xff] %vm28_vm0, %v147_v16 }
  0xfe   :  { %v154_v21 = vld [vmem:[#allocation2] sm:$0xff] }
  0xff   :  { %v163_v22 = vadd.f32 %v240_v19, %v154_v21 }
 0x100   :  { %v155_v24 = vld [vmem:[#allocation2 + $0x8] sm:$0xff] }
 0x101   :  { %v169_v25 = vadd.f32 %v249_v20, %v163_v22  ;;  %v164_v26 = vadd.f32 %v240_v19, %v155_v24 }
 0x103   :  { %v171_v27 = vsel %vm28_vm0, %v169_v25, 0.0  ;;  %v170_v28 = vadd.f32 %v250_v23, %v164_v26 }
 0x104   :  { %172 = vadd.xlane.f32.xlu0 %v171_v27 }
 0x105   :  { %v174_v29 = vsel %vm28_vm0, %v170_v28, 0.0 }
 0x108   :  { %175 = vadd.xlane.f32.xlu0 %v174_v29 }
 0x191   :  { %v173_v30 = vpop.xlane.xlu0 %172 }
 0x192   :  { %v178_v31 = vmul.f32 0.03125, %v173_v30 }
 0x194   :  { %v180_v32 = vsub.f32 %v169_v25, %v178_v31 }
 0x195   :  { %v176_v33 = vpop.xlane.xlu0 %175 }
 0x196   :  { %v179_v34 = vmul.f32 0.03125, %v176_v33  ;;  %v182_v35 = vmul.f32 %v180_v32, %v180_v32 }
 0x198   :  { %v181_v36 = vsub.f32 %v170_v28, %v179_v34  ;;  %v184_v37 = vsel %vm28_vm0, %v182_v35, 0.0 }
 0x199   :  { %185 = vadd.xlane.f32.xlu1 %v184_v37 }
 0x19a   :  { %v183_v38 = vmul.f32 %v181_v36, %v181_v36 }
 0x19c   :  { %v187_v39 = vsel %vm28_vm0, %v183_v38, 0.0 }
 0x19d   :  { %188 = vadd.xlane.f32.xlu1 %v187_v39 }
 0x226   :  { %v186_v40 = vpop.xlane.xlu1 %185 }
 0x227   :  { %v190_v41 = vmul.f32 0.03125, %v186_v40 }
 0x229   :  { %v192_v42 = vadd.f32 1e-12, %v190_v41 }
 0x22a   :  { %v189_v43 = vpop.xlane.xlu1 %188 }
 0x22b   :  { %291 = vrsqrt.f32 %v192_v42  ;;  %v191_v44 = vmul.f32 0.03125, %v189_v43 }
 0x22d   :  { %v193_v45 = vadd.f32 1e-12, %v191_v44 }
 0x22f   :  { %293 = vrsqrt.f32 %v193_v45 }
 0x235   :  { %v292_v46 = vpop.eup %291 }
 0x236   :  { %v196_v48 = vmul.f32 %v292_v46, %v180_v32 }
 0x238   :  { %v205_v50 = vmul.f32 %v241_v47, %v196_v48 }
 0x239   :  { %v294_v51 = vpop.eup %293 }
 0x23a   :  { %v214_v52 = vadd.f32 %v242_v49, %v205_v50  ;;  %v197_v53 = vmul.f32 %v294_v51, %v181_v36 }
 0x23c   :  { %v245_v54 = vpack.c.bf16 %v214_v52, %v214_v52  ;;  %v206_v55 = vmul.f32 %v241_v47, %v197_v53 }
 0x23e   :  { %225 = vst.msk [vmem:[%s391_s6] sm:$0xf] %vm224_vm2, %v245_v54  ;;  %v215_v56 = vadd.f32 %v242_v49, %v206_v55 }
 0x240   :  { %v246_v57 = vpack.c.bf16 %v215_v56, %v215_v56 }
 0x242   :  { %226 = vst.msk [vmem:[%s391_s6 + $0x4] sm:$0xf] %vm224_vm2, %v246_v57 }

</bundles_post_ra>
